<compile_context>
chip_gen: v5e
topology: v5e:2x2
jax: 0.10.0
libtpu: 0.0.40
codegen_flags: <defaults>
</compile_context>

<pallas_src>
import functools

import jax
import jax.numpy as jnp
from jax.experimental import pallas as pl
from jax.experimental.pallas import tpu as pltpu


LANE = 128  # TPU lane width; feature/vocab dims padded to this for lane-dense MXU/stores


def _round_up(n, m):
    return ((n + m - 1) // m) * m


# ------------------------------ fused kernel ------------------------------- #
def fused_kernel(x_ref, ids_ref, wenc_ref, benc_ref, emb_ref, wq_ref, wkv_ref,
                 wo_ref, o_ref, *, batch, seq_src, seq_tgt, d_model):
    """Fused encoder + cross-attention decoder forward (single VMEM block).

    x_ref    : [B*S, C]      flattened image pixels (channels on lanes)
    ids_ref  : [B*T, 1]      int32 target token ids
    wenc_ref : [C,  Dp]      encoder 1x1-conv weight (D zero-padded to Dp=128)
    benc_ref : [1,  Dp]      encoder bias
    emb_ref  : [Vocp, Dp]    token embedding table (vocab rows padded to 128)
    wq_ref   : [Dp, Dp]      query projection
    wkv_ref  : [Dp, 2Dp]     fused key|value projection
    wo_ref   : [Dp, Vp]      output projection (vocab padded to Vp=128)
    o_ref    : [B*T, Vp]     lane-dense logits slab
    """
    dp = wq_ref.shape[0]
    vocab_p = emb_ref.shape[0]

    # ---- encoder folded into K/V (C is a rank bottleneck, compose weights) ----
    #   kv = (x @ Wenc + benc) @ Wkv  ==  x @ (Wenc @ Wkv) + (benc @ Wkv)
    w_kv_eff = jnp.dot(wenc_ref[...], wkv_ref[...],
                       preferred_element_type=jnp.float32)        # [C, 2Dp]  (tiny)
    b_kv_eff = jnp.dot(benc_ref[...], wkv_ref[...],
                       preferred_element_type=jnp.float32)        # [1, 2Dp]  (tiny)
    kv = (
        jnp.dot(x_ref[...], w_kv_eff, preferred_element_type=jnp.float32)
        + b_kv_eff
    )                                                             # [B*S, 2Dp]
    k = kv[:, :dp].reshape(batch, seq_src, dp)                    # [B, S, Dp]
    v = kv[:, dp:].reshape(batch, seq_src, dp)                    # [B, S, Dp]

    # ---- decoder: token embedding folded in (exact one-hot matmul) ----------
    onehot = (
        ids_ref[...]
        == jax.lax.broadcasted_iota(jnp.int32, (batch * seq_tgt, vocab_p), 1)
    ).astype(jnp.float32)                                         # [B*T, Vocp]
    emb2d = jnp.dot(onehot, emb_ref[...], preferred_element_type=jnp.float32)
    q = jnp.dot(emb2d, wq_ref[...], preferred_element_type=jnp.float32)
    q = q.reshape(batch, seq_tgt, dp)                             # [B, T, Dp]

    # ---- scaled dot-product cross-attention (no explicit k transpose) -------
    scale = 1.0 / (float(d_model) ** 0.5)                         # scale uses real D
    scores = jnp.einsum("btd,bsd->bts", q, k,
                        preferred_element_type=jnp.float32) * scale
    m = jnp.max(scores, axis=-1, keepdims=True)
    p = jnp.exp(scores - m)
    # exact reciprocal keeps the 1e-4 match vs. the f32 reference
    p = p * pl.reciprocal(jnp.sum(p, axis=-1, keepdims=True), approx=False)
    attn = jnp.einsum("bts,bsd->btd", p, v,
                      preferred_element_type=jnp.float32)         # [B, T, Dp]

    # ---- output projection, lane-dense [B*T, Vp] store ----------------------
    o_ref[...] = jnp.dot(attn.reshape(batch * seq_tgt, dp), wo_ref[...],
                         preferred_element_type=jnp.float32)


# ------------------------------ Model wrapper ------------------------------ #
def model_forward(x_nchw, tgt_seq, params):
    B, C, H, W = x_nchw.shape
    S = H * W
    T = tgt_seq.shape[1]
    D = params["wq"].shape[0]
    V = params["wo"].shape[1]
    VOCAB = params["embed"].shape[0]
    Dp = _round_up(D, LANE)
    Vp = _round_up(V, LANE)
    VOCABp = _round_up(VOCAB, LANE)

    # NCHW -> [B*S, C] pixel-token slab (feature channels on lanes).
    x2d = jnp.transpose(x_nchw, (0, 2, 3, 1)).reshape(B * S, C)
    ids2d = tgt_seq.reshape(B * T, 1).astype(jnp.int32)

    # Zero-pad feature / vocab dims to 128 lanes (lane-dense MXU passes and
    # unmasked stores). Padding lanes/rows stay exactly zero end-to-end, so
    # results in the real lanes are unchanged.
    w_enc = jnp.pad(params["w_enc"], ((0, 0), (0, Dp - D)))
    b_enc = jnp.pad(params["b_enc"], ((0, 0), (0, Dp - D)))
    embed = jnp.pad(params["embed"], ((0, VOCABp - VOCAB), (0, Dp - D)))
    wq = jnp.pad(params["wq"], ((0, Dp - D), (0, Dp - D)))
    wk = jnp.pad(params["wk"], ((0, Dp - D), (0, Dp - D)))
    wv = jnp.pad(params["wv"], ((0, Dp - D), (0, Dp - D)))
    wkv = jnp.concatenate([wk, wv], axis=1)                    # [Dp, 2*Dp]
    wo = jnp.pad(params["wo"], ((0, Dp - D), (0, Vp - V)))     # [Dp, Vp]

    kernel = functools.partial(
        fused_kernel, batch=B, seq_src=S, seq_tgt=T, d_model=D
    )

    flops = 2 * (
        C * Dp * 2 * Dp           # Wenc @ Wkv composition
        + Dp * 2 * Dp             # benc @ Wkv
        + B * S * C * 2 * Dp      # fused x -> k|v projection
        + B * T * VOCABp * Dp     # embedding one-hot matmul
        + B * T * Dp * Dp         # q projection
        + 2 * B * T * S * Dp      # q@k^T and p@v
        + B * T * Dp * Vp         # output projection
    )
    bytes_accessed = 4 * (
        x2d.size + ids2d.size + w_enc.size + b_enc.size + embed.size
        + wq.size + wkv.size + wo.size + B * T * Vp
    )

    # grid=() : the whole (tiny) problem is a single VMEM-resident block,
    # so there is exactly one launch and zero per-grid-step overhead.
    vmem_spec = pl.BlockSpec(memory_space=pltpu.MemorySpace.VMEM)
    out_pad = pl.pallas_call(
        kernel,
        out_shape=jax.ShapeDtypeStruct((B * T, Vp), jnp.float32),
        in_specs=[vmem_spec] * 8,
        out_specs=vmem_spec,
        cost_estimate=pl.CostEstimate(
            flops=flops, transcendentals=B * T * S, bytes_accessed=bytes_accessed
        ),
    )(x2d, ids2d, w_enc, b_enc, embed, wq, wkv, wo)

    # Strip vocab padding, restore [B, T, V].
    return out_pad.reshape(B, T, Vp)[:, :, :V]


# TODO(synk): `generate` (autoregressive sampling loop) and `data_parallel`
# are not kernelized; only the forward hot path is implemented as a kernel.


# ------------------------------ f32 reference ------------------------------ #
def reference_forward(x_nchw, tgt_seq, params):
    B, C, H, W = x_nchw.shape
    xt = jnp.transpose(x_nchw, (0, 2, 3, 1)).reshape(B, H * W, C)
    enc = xt @ params["w_enc"] + params["b_enc"]
    emb = jnp.take(params["embed"], tgt_seq, axis=0)
    q = emb @ params["wq"]
    k = enc @ params["wk"]
    v = enc @ params["wv"]
    scores = jnp.einsum("btd,bsd->bts", q, k) / jnp.sqrt(
        jnp.float32(q.shape[-1])
    )
    p = jax.nn.softmax(scores, axis=-1)
    attn = jnp.einsum("bts,bsd->btd", p, v)
    return attn @ params["wo"]


if __name__ == "__main__":
    B, C, H, W = 2, 4, 16, 16
    T, D, VOCAB = 8, 32, 64

    key = jax.random.PRNGKey(0)
    ks = jax.random.split(key, 9)

    x = jax.random.normal(ks[0], (B, C, H, W), dtype=jnp.float32)
    tgt_seq = jax.random.randint(ks[1], (B, T), 0, VOCAB, dtype=jnp.int32)

    params = {
        "w_enc": jax.random.normal(ks[2], (C, D), dtype=jnp.float32) * 0.1,
        "b_enc": jax.random.normal(ks[3], (1, D), dtype=jnp.float32) * 0.1,
        "embed": jax.random.normal(ks[4], (VOCAB, D), dtype=jnp.float32) * 0.1,
        "wq": jax.random.normal(ks[5], (D, D), dtype=jnp.float32) * 0.1,
        "wk": jax.random.normal(ks[6], (D, D), dtype=jnp.float32) * 0.1,
        "wv": jax.random.normal(ks[7], (D, D), dtype=jnp.float32) * 0.1,
        "wo": jax.random.normal(ks[8], (D, VOCAB), dtype=jnp.float32) * 0.1,
    }

    fwd = jax.jit(model_forward)
    out = jax.block_until_ready(fwd(x, tgt_seq, params))
    ref = jax.block_until_ready(reference_forward(x, tgt_seq, params))

    assert out.shape == (B, T, VOCAB)
    assert jnp.allclose(out, ref, atol=1e-4, rtol=1e-4), float(
        jnp.max(jnp.abs(out - ref))
    )
    print("KERNEL_OK")
</pallas_src>

<mosaic_0001>
module attributes {stable_mosaic.version = 11 : i64} {
  func.func @fused_kernel(%arg0: memref<512x4xf32, #tpu.memory_space<vmem>>, %arg1: memref<16x1xi32, #tpu.memory_space<vmem>>, %arg2: memref<4x128xf32, #tpu.memory_space<vmem>>, %arg3: memref<1x128xf32, #tpu.memory_space<vmem>>, %arg4: memref<128x128xf32, #tpu.memory_space<vmem>>, %arg5: memref<128x128xf32, #tpu.memory_space<vmem>>, %arg6: memref<128x256xf32, #tpu.memory_space<vmem>>, %arg7: memref<128x128xf32, #tpu.memory_space<vmem>>, %arg8: memref<16x128xf32, #tpu.memory_space<vmem>>) attributes {dimension_semantics = [], scalar_prefetch = 0 : i64, scratch_operands = 0 : i64, tpu.core_type = #tpu.core_type<tc>} {
    %c0 = arith.constant 0 : index
    %c0_0 = arith.constant 0 : index
    %0 = vector.load %arg2[%c0, %c0_0] : memref<4x128xf32, #tpu.memory_space<vmem>>, vector<4x128xf32>
    %c0_1 = arith.constant 0 : index
    %c0_2 = arith.constant 0 : index
    %1 = vector.load %arg6[%c0_1, %c0_2] : memref<128x256xf32, #tpu.memory_space<vmem>>, vector<128x256xf32>
    %cst = arith.constant dense<0.000000e+00> : vector<4x256xf32>
    %2 = tpu.matmul %0, %1, %cst {dimension_numbers = #tpu.dot_dimension_numbers<[1], [0], [0], [1], [0, 0, 1, 1], [], []>} : vector<4x128xf32>, vector<128x256xf32>, vector<4x256xf32> -> vector<4x256xf32>
    %c0_3 = arith.constant 0 : index
    %c0_4 = arith.constant 0 : index
    %3 = vector.load %arg3[%c0_3, %c0_4] : memref<1x128xf32, #tpu.memory_space<vmem>>, vector<1x128xf32>
    %c0_5 = arith.constant 0 : index
    %c0_6 = arith.constant 0 : index
    %4 = vector.load %arg6[%c0_5, %c0_6] : memref<128x256xf32, #tpu.memory_space<vmem>>, vector<128x256xf32>
    %cst_7 = arith.constant dense<0.000000e+00> : vector<1x256xf32>
    %5 = tpu.matmul %3, %4, %cst_7 {dimension_numbers = #tpu.dot_dimension_numbers<[1], [0], [0], [1], [0, 0, 1, 1], [], []>} : vector<1x128xf32>, vector<128x256xf32>, vector<1x256xf32> -> vector<1x256xf32>
    %c0_8 = arith.constant 0 : index
    %c0_9 = arith.constant 0 : index
    %6 = vector.load %arg0[%c0_8, %c0_9] : memref<512x4xf32, #tpu.memory_space<vmem>>, vector<512x4xf32>
    %cst_10 = arith.constant dense<0.000000e+00> : vector<512x256xf32>
    %7 = tpu.matmul %6, %2, %cst_10 {dimension_numbers = #tpu.dot_dimension_numbers<[1], [0], [0], [1], [0, 0, 1, 1], [], []>} : vector<512x4xf32>, vector<4x256xf32>, vector<512x256xf32> -> vector<512x256xf32>
    %8 = vector.broadcast %5 : vector<1x256xf32> to vector<512x256xf32>
    %9 = arith.addf %7, %8 : vector<512x256xf32>
    %10 = vector.extract_strided_slice %9 {offsets = [0, 0], sizes = [512, 128], strides = [1, 1]} : vector<512x256xf32> to vector<512x128xf32>
    %11 = vector.shape_cast %10 : vector<512x128xf32> to vector<2x256x128xf32>
    %12 = vector.extract_strided_slice %9 {offsets = [0, 128], sizes = [512, 128], strides = [1, 1]} : vector<512x256xf32> to vector<512x128xf32>
    %13 = vector.shape_cast %12 : vector<512x128xf32> to vector<2x256x128xf32>
    %c0_11 = arith.constant 0 : index
    %c0_12 = arith.constant 0 : index
    %14 = vector.load %arg1[%c0_11, %c0_12] : memref<16x1xi32, #tpu.memory_space<vmem>>, vector<16x1xi32>
    %15 = tpu.iota {dimensions = array<i32: 1>} : vector<16x128xi32>
    %16 = vector.broadcast %14 : vector<16x1xi32> to vector<16x128xi32>
    %17 = arith.cmpi eq, %16, %15 : vector<16x128xi32>
    %18 = arith.extui %17 : vector<16x128xi1> to vector<16x128xi32>
    %19 = arith.sitofp %18 : vector<16x128xi32> to vector<16x128xf32>
    %c0_13 = arith.constant 0 : index
    %c0_14 = arith.constant 0 : index
    %20 = vector.load %arg4[%c0_13, %c0_14] : memref<128x128xf32, #tpu.memory_space<vmem>>, vector<128x128xf32>
    %cst_15 = arith.constant dense<0.000000e+00> : vector<16x128xf32>
    %21 = tpu.matmul %19, %20, %cst_15 {dimension_numbers = #tpu.dot_dimension_numbers<[1], [0], [0], [1], [0, 0, 1, 1], [], []>} : vector<16x128xf32>, vector<128x128xf32>, vector<16x128xf32> -> vector<16x128xf32>
    %c0_16 = arith.constant 0 : index
    %c0_17 = arith.constant 0 : index
    %22 = vector.load %arg5[%c0_16, %c0_17] : memref<128x128xf32, #tpu.memory_space<vmem>>, vector<128x128xf32>
    %cst_18 = arith.constant dense<0.000000e+00> : vector<16x128xf32>
    %23 = tpu.matmul %21, %22, %cst_18 {dimension_numbers = #tpu.dot_dimension_numbers<[1], [0], [0], [1], [0, 0, 1, 1], [], []>} : vector<16x128xf32>, vector<128x128xf32>, vector<16x128xf32> -> vector<16x128xf32>
    %24 = vector.shape_cast %23 : vector<16x128xf32> to vector<2x8x128xf32>
    "tpu.trace_start"() <{level = 10 : i32, message = "btd,bsd->bts"}> : () -> ()
    %cst_19 = arith.constant dense<0.000000e+00> : vector<2x8x256xf32>
    %25 = tpu.matmul %24, %11, %cst_19 {dimension_numbers = #tpu.dot_dimension_numbers<[2], [2], [1], [1], [0, 0, 0, 1, 1, 1], [0], [0]>} : vector<2x8x128xf32>, vector<2x256x128xf32>, vector<2x8x256xf32> -> vector<2x8x256xf32>
    "tpu.trace_stop"() : () -> ()
    %cst_20 = arith.constant 0.176776692 : f32
    %26 = vector.broadcast %cst_20 : f32 to vector<2x8x256xf32>
    %27 = arith.mulf %25, %26 : vector<2x8x256xf32>
    %cst_21 = arith.constant dense<0xFF800000> : vector<2x8xf32>
    %28 = vector.multi_reduction <maximumf>, %27, %cst_21 [2] : vector<2x8x256xf32> to vector<2x8xf32>
    %29 = vector.shape_cast %28 : vector<2x8xf32> to vector<2x8x1xf32>
    %30 = vector.broadcast %29 : vector<2x8x1xf32> to vector<2x8x256xf32>
    %31 = arith.subf %27, %30 : vector<2x8x256xf32>
    %32 = math.exp %31 : vector<2x8x256xf32>
    %cst_22 = arith.constant dense<0.000000e+00> : vector<2x8xf32>
    %33 = vector.multi_reduction <add>, %32, %cst_22 [2] : vector<2x8x256xf32> to vector<2x8xf32>
    %34 = vector.shape_cast %33 : vector<2x8xf32> to vector<2x8x1xf32>
    %35 = tpu.reciprocal %34 : vector<2x8x1xf32> -> vector<2x8x1xf32>
    %36 = vector.broadcast %35 : vector<2x8x1xf32> to vector<2x8x256xf32>
    %37 = arith.mulf %32, %36 : vector<2x8x256xf32>
    "tpu.trace_start"() <{level = 10 : i32, message = "bts,bsd->btd"}> : () -> ()
    %cst_23 = arith.constant dense<0.000000e+00> : vector<2x8x128xf32>
    %38 = tpu.matmul %37, %13, %cst_23 {dimension_numbers = #tpu.dot_dimension_numbers<[2], [1], [1], [2], [0, 0, 0, 1, 1, 2], [0], [0]>} : vector<2x8x256xf32>, vector<2x256x128xf32>, vector<2x8x128xf32> -> vector<2x8x128xf32>
    "tpu.trace_stop"() : () -> ()
    %39 = vector.shape_cast %38 : vector<2x8x128xf32> to vector<16x128xf32>
    %c0_24 = arith.constant 0 : index
    %c0_25 = arith.constant 0 : index
    %40 = vector.load %arg7[%c0_24, %c0_25] : memref<128x128xf32, #tpu.memory_space<vmem>>, vector<128x128xf32>
    %cst_26 = arith.constant dense<0.000000e+00> : vector<16x128xf32>
    %41 = tpu.matmul %39, %40, %cst_26 {dimension_numbers = #tpu.dot_dimension_numbers<[1], [0], [0], [1], [0, 0, 1, 1], [], []>} : vector<16x128xf32>, vector<128x128xf32>, vector<16x128xf32> -> vector<16x128xf32>
    %c0_27 = arith.constant 0 : index
    %c0_28 = arith.constant 0 : index
    %42 = vector.load %arg8[%c0_27, %c0_28] : memref<16x128xf32, #tpu.memory_space<vmem>>, vector<16x128xf32>
    tpu.vector_store %arg8[%c0_27, %c0_28], %41 {strides = array<i32>} : memref<16x128xf32, #tpu.memory_space<vmem>>, vector<16x128xf32>,
    return
  }
}

</mosaic_0001>

<bundles_post_ra>
// kernel: model_forward.1
= control target key start
LH: loop header
LB: loop body
LE: loop exit
PB: predicated region body
PF: predicated region fallthrough
CT: control target
= control target key end

     0   :  { %s2490_s0 = inlined_call_operand.vmem [shape: f32[512,4], index: 0, kind: input, shape index: {}]   ;;  %s2491_s1 = inlined_call_operand.vmem [shape: s32[16,1], index: 1, kind: input, shape index: {}]   ;;  %s2492_s2 = inlined_call_operand.vmem [shape: f32[4,128], index: 2, kind: input, shape index: {}]   ;;  %s2493_s3 = inlined_call_operand.vmem [shape: f32[1,128], index: 3, kind: input, shape index: {}]   ;;  %s2494_s4 = inlined_call_operand.vmem [shape: f32[128,128], index: 4, kind: input, shape index: {}]   ;;  %s2495_s5 = inlined_call_operand.vmem [shape: f32[128,128], index: 5, kind: input, shape index: {}]   ;;  %s2496_s6 = inlined_call_operand.vmem [shape: f32[128,256], index: 6, kind: input, shape index: {}]   ;;  %s2497_s7 = inlined_call_operand.vmem [shape: f32[128,128], index: 7, kind: input, shape index: {}]   ;;  %s2498_s8 = inlined_call_operand.hbm [shape: f32[16,128], index: 8, kind: output, shape index: {}]  }
   0x1   :  { %v61_v0 = vld [vmem:[%s2496_s6 + $0xf0] sm:$0xff]  ;;  %v1438_v1 = vld [vmem:[%s2496_s6 + $0xf8] sm:$0xff]  ;;  %v59_v2 = vld [vmem:[%s2496_s6 + $0xe0] sm:$0xff] }
   0x2   :  { %63 = vmatpush.msra.mxu0 %v61_v0  ;;  %83 = vmatpush.msra.mxu1 %v1438_v1  ;;  %v1447_v3 = vld [vmem:[%s2496_s6 + $0xe8] sm:$0xff]  ;;  %v57_v4 = vld [vmem:[%s2496_s6 + $0xd0] sm:$0xff]  ;;  %v1455_v5 = vld [vmem:[%s2496_s6 + $0xd8] sm:$0xff] }
   0x3   :  { %104 = vmatpush.msra.mxu3 %v61_v0  ;;  %v55_v6 = vld [vmem:[%s2496_s6 + $0xc0] sm:$0xff]  ;;  %v1464_v7 = vld [vmem:[%s2496_s6 + $0xc8] sm:$0xff]  ;;  %v53_v8 = vld [vmem:[%s2496_s6 + $0xb0] sm:$0xff] }
   0x4   :  { %64 = vmatpush.msra.mxu0 %v59_v2  ;;  %84 = vmatpush.msra.mxu1 %v1447_v3  ;;  %v1473_v9 = vld [vmem:[%s2496_s6 + $0xb8] sm:$0xff]  ;;  %v51_v10 = vld [vmem:[%s2496_s6 + $0xa0] sm:$0xff]  ;;  %v1482_v11 = vld [vmem:[%s2496_s6 + $0xa8] sm:$0xff] }
   0x5   :  { %105 = vmatpush.msra.mxu3 %v59_v2  ;;  %v49_v12 = vld [vmem:[%s2496_s6 + $0x90] sm:$0xff]  ;;  %v50_v13 = vld [vmem:[%s2496_s6 + $0x98] sm:$0xff] }
   0x6   :  { %65 = vmatpush.msra.mxu0 %v57_v4  ;;  %85 = vmatpush.msra.mxu1 %v1455_v5 }
   0x7   :  { %106 = vmatpush.msra.mxu3 %v57_v4 }
   0x8   :  { %66 = vmatpush.msra.mxu0 %v55_v6  ;;  %86 = vmatpush.msra.mxu1 %v1464_v7 }
   0x9   :  { %107 = vmatpush.msra.mxu3 %v55_v6 }
   0xa   :  { %67 = vmatpush.msra.mxu0 %v53_v8  ;;  %87 = vmatpush.msra.mxu1 %v1473_v9 }
   0xb   :  { %108 = vmatpush.msra.mxu3 %v53_v8 }
   0xc   :  { %68 = vmatpush.msra.mxu0 %v51_v10  ;;  %88 = vmatpush.msra.mxu1 %v1482_v11 }
   0xd   :  { %13 = vsyncpa [#allocation3], 0  ;;  %v47_v14 = vld [vmem:[%s2496_s6 + $0x80] sm:$0xff]  ;;  %v48_v15 = vld [vmem:[%s2496_s6 + $0x88] sm:$0xff]  ;;  %109 = vmatpush.msra.mxu3 %v51_v10  ;;  %vm403_vm0 = vcmask 1043456   ;;  %vm210_vm1 = vcmask 31744  }
   0xe   :  { %69 = vmatpush.msra.mxu0 %v49_v12  ;;  %89 = vmatpush.msra.mxu1 %v50_v13  ;;  %v45_v16 = vld [vmem:[%s2496_s6 + $0x70] sm:$0xff]  ;;  %v46_v17 = vld [vmem:[%s2496_s6 + $0x78] sm:$0xff]  ;;  %v43_v18 = vld [vmem:[%s2496_s6 + $0x60] sm:$0xff]  ;;  %v1382_v45 = vmov 0   ;;  %s1384_s17 = smov [#allocation2]   ;;  %s1189_s20 = sshll.u32 %s2498_s8, 4  ;;  %s1190_s20 = int_to_ptr.hbm [resolvable:$true] %s1189_s20 }
   0xf   :  { %110 = vmatpush.msra.mxu3 %v49_v12  ;;  %v44_v19 = vld [vmem:[%s2496_s6 + $0x68] sm:$0xff]  ;;  %v41_v20 = vld [vmem:[%s2496_s6 + $0x50] sm:$0xff]  ;;  %v42_v21 = vld [vmem:[%s2496_s6 + $0x58] sm:$0xff]  ;;  %1343 = vset.pattern.permute.xlu0 %v1382_v45  ;;  %s1385_s21 = smov 128   ;;  %s1386_s22 = smov 8  }
  0x10   :  { %70 = vmatpush.msra.mxu0 %v47_v14  ;;  %90 = vmatpush.msra.mxu1 %v48_v15  ;;  %v39_v22 = vld [vmem:[%s2496_s6 + $0x40] sm:$0xff]  ;;  %v40_v23 = vld [vmem:[%s2496_s6 + $0x48] sm:$0xff]  ;;  %v37_v24 = vld [vmem:[%s2496_s6 + $0x30] sm:$0xff] }
  0x11   :  { %111 = vmatpush.msra.mxu3 %v47_v14  ;;  %v38_v25 = vld [vmem:[%s2496_s6 + $0x38] sm:$0xff]  ;;  %v35_v26 = vld [vmem:[%s2496_s6 + $0x20] sm:$0xff]  ;;  %v36_v27 = vld [vmem:[%s2496_s6 + $0x28] sm:$0xff] }
  0x12   :  { %71 = vmatpush.msra.mxu0 %v45_v16  ;;  %91 = vmatpush.msra.mxu1 %v46_v17  ;;  %v33_v28 = vld [vmem:[%s2496_s6 + $0x10] sm:$0xff]  ;;  %v34_v29 = vld [vmem:[%s2496_s6 + $0x18] sm:$0xff]  ;;  %v31_v30 = vld [vmem:[%s2496_s6] sm:$0xff] }
  0x13   :  { %112 = vmatpush.msra.mxu3 %v45_v16  ;;  %v32_v31 = vld [vmem:[%s2496_s6 + $0x8] sm:$0xff]  ;;  %v30_v32 = vld [vmem:[%s2492_s2] sm:$0xf]  ;;  %v190_v37 = vld [vmem:[%s2490_s0 + $0x170] sm:$0xff] }
  0x14   :  { %72 = vmatpush.msra.mxu0 %v43_v18  ;;  %92 = vmatpush.msra.mxu1 %v44_v19  ;;  %v103_v33 = vld [vmem:[%s2493_s3] sm:$0x1]  ;;  %v191_v38 = vld [vmem:[%s2490_s0 + $0x178] sm:$0xff]  ;;  %v145_v39 = vld [vmem:[%s2490_s0 + $0x8] sm:$0xff] }
  0x15   :  { %113 = vmatpush.msra.mxu3 %v43_v18  ;;  %v144_v36 = vld [vmem:[%s2490_s0] sm:$0xff]  ;;  %v146_v41 = vld [vmem:[%s2490_s0 + $0x10] sm:$0xff]  ;;  %v193_v42 = vld [vmem:[%s2490_s0 + $0x188] sm:$0xff] }
  0x16   :  { %73 = vmatpush.msra.mxu0 %v41_v20  ;;  %93 = vmatpush.msra.mxu1 %v42_v21  ;;  %v192_v40 = vld [vmem:[%s2490_s0 + $0x180] sm:$0xff]  ;;  %v147_v43 = vld [vmem:[%s2490_s0 + $0x18] sm:$0xff]  ;;  %v194_v46 = vld [vmem:[%s2490_s0 + $0x190] sm:$0xff] }
  0x17   :  { %114 = vmatpush.msra.mxu3 %v41_v20  ;;  %v828_v44 = vld [vmem:[%s2491_s1] sm:$0xff]  ;;  %v195_v48 = vld [vmem:[%s2490_s0 + $0x198] sm:$0xff]  ;;  %v149_v49 = vld [vmem:[%s2490_s0 + $0x28] sm:$0xff] }
  0x18   :  { %74 = vmatpush.msra.mxu0 %v39_v22  ;;  %94 = vmatpush.msra.mxu1 %v40_v23  ;;  %v148_v47 = vld [vmem:[%s2490_s0 + $0x20] sm:$0xff]  ;;  %v150_v51 = vld [vmem:[%s2490_s0 + $0x30] sm:$0xff]  ;;  %v197_v52 = vld [vmem:[%s2490_s0 + $0x1a8] sm:$0xff] }
  0x19   :  { %115 = vmatpush.msra.mxu3 %v39_v22  ;;  %833 = vperm.xlu0 %1343, %v828_v44   ;;  %v196_v50 = vld [vmem:[%s2490_s0 + $0x1a0] sm:$0xff]  ;;  %v151_v53 = vld [vmem:[%s2490_s0 + $0x38] sm:$0xff]  ;;  %v198_v54 = vld [vmem:[%s2490_s0 + $0x1b0] sm:$0xff] }
  0x1a   :  { %75 = vmatpush.msra.mxu0 %v37_v24  ;;  %95 = vmatpush.msra.mxu1 %v38_v25  ;;  %v152_v55 = vld [vmem:[%s2490_s0 + $0x40] sm:$0xff]  ;;  %v199_v56 = vld [vmem:[%s2490_s0 + $0x1b8] sm:$0xff]  ;;  %v153_v57 = vld [vmem:[%s2490_s0 + $0x48] sm:$0xff] }
  0x1b   :  { %116 = vmatpush.msra.mxu3 %v37_v24  ;;  %v200_v58 = vld [vmem:[%s2490_s0 + $0x1c0] sm:$0xff]  ;;  %v154_v59 = vld [vmem:[%s2490_s0 + $0x50] sm:$0xff]  ;;  %v201_v60 = vld [vmem:[%s2490_s0 + $0x1c8] sm:$0xff] }
  0x1c   :  { %76 = vmatpush.msra.mxu0 %v35_v26  ;;  %96 = vmatpush.msra.mxu1 %v36_v27  ;;  %v155_v61 = vld [vmem:[%s2490_s0 + $0x58] sm:$0xff]  ;;  %v156_v62 = vld [vmem:[%s2490_s0 + $0x60] sm:$0xff]  ;;  %v202_v63 = vld [vmem:[%s2490_s0 + $0x1d0] sm:$0xff] }
  0x1d   :  { %117 = vmatpush.msra.mxu3 %v35_v26  ;;  %v157_v0 = vld [vmem:[%s2490_s0 + $0x68] sm:$0xff]  ;;  %v203_v2 = vld [vmem:[%s2490_s0 + $0x1d8] sm:$0xff]  ;;  %v204_v4 = vld [vmem:[%s2490_s0 + $0x1e0] sm:$0xff] }
  0x1e   :  { %77 = vmatpush.msra.mxu0 %v33_v28  ;;  %97 = vmatpush.msra.mxu1 %v34_v29  ;;  %v857_v6 = vld [vmem:[%s2494_s4 + $0x68] sm:$0xff]  ;;  %v159_v8 = vld [vmem:[%s2490_s0 + $0x78] sm:$0xff]  ;;  %v854_v12 = vld [vmem:[%s2494_s4 + $0x50] sm:$0xff] }
  0x1f   :  { %118 = vmatpush.msra.mxu3 %v33_v28  ;;  %v205_v10 = vld [vmem:[%s2490_s0 + $0x1e8] sm:$0xff]  ;;  %v160_v16 = vld [vmem:[%s2490_s0 + $0x80] sm:$0xff]  ;;  %v850_v20 = vld [vmem:[%s2494_s4 + $0x30] sm:$0xff] }
  0x20   :  { %78 = vmatpush.msra.mxu0 %v31_v30  ;;  %98 = vmatpush.msra.mxu1 %v32_v31  ;;  %v852_v18 = vld [vmem:[%s2494_s4 + $0x40] sm:$0xff]  ;;  %v161_v24 = vld [vmem:[%s2490_s0 + $0x88] sm:$0xff]  ;;  %v847_v28 = vld [vmem:[%s2494_s4 + $0x18] sm:$0xff] }
  0x21   :  { %79 = vmatmul.f32.vlgmr.msra.gmra.mxu0 %v30_v32  ;;  %99 = vmatmul.f32.vlgmr.msra.gmra.mxu1 %v30_v32  ;;  %v849_v26 = vld [vmem:[%s2494_s4 + $0x28] sm:$0xff] }
  0x22   :  { %119 = vmatpush.msra.mxu3 %v31_v30 }
  0x23   :  { %120 = vmatmul.f32.vlgmr.msra.gmra.mxu3 %v103_v33 }
  0x24   :  { %124 = vmatpush.msrb.mxu3 %v1438_v1  ;;  %v859_v1 = vld [vmem:[%s2494_s4 + $0x78] sm:$0xff] }
  0x26   :  { %125 = vmatpush.msrb.mxu3 %v1447_v3  ;;  %v158_v3 = vld [vmem:[%s2490_s0 + $0x70] sm:$0xff] }
  0x28   :  { %126 = vmatpush.msrb.mxu3 %v1455_v5  ;;  %v858_v5 = vld [vmem:[%s2494_s4 + $0x70] sm:$0xff] }
  0x2a   :  { %127 = vmatpush.msrb.mxu3 %v1464_v7  ;;  %v829_v7 = vld [vmem:[%s2491_s1 + $0x8] sm:$0xff] }
  0x2b   :  { %836 = vperm.xlu0 %1343, %v829_v7  }
  0x2c   :  { %128 = vmatpush.msrb.mxu3 %v1473_v9  ;;  %v856_v9 = vld [vmem:[%s2494_s4 + $0x60] sm:$0xff] }
  0x2e   :  { %129 = vmatpush.msrb.mxu3 %v1482_v11  ;;  %v855_v11 = vld [vmem:[%s2494_s4 + $0x58] sm:$0xff] }
  0x30   :  { %130 = vmatpush.msrb.mxu3 %v50_v13  ;;  %v853_v13 = vld [vmem:[%s2494_s4 + $0x48] sm:$0xff] }
  0x32   :  { %131 = vmatpush.msrb.mxu3 %v48_v15 }
  0x34   :  { %132 = vmatpush.msrb.mxu3 %v46_v17  ;;  %v206_v17 = vld [vmem:[%s2490_s0 + $0x1f0] sm:$0xff] }
  0x36   :  { %133 = vmatpush.msrb.mxu3 %v44_v19  ;;  %v851_v19 = vld [vmem:[%s2494_s4 + $0x38] sm:$0xff] }
  0x38   :  { %134 = vmatpush.msrb.mxu3 %v42_v21 }
  0x3a   :  { %135 = vmatpush.msrb.mxu3 %v40_v23 }
  0x3c   :  { %136 = vmatpush.msrb.mxu3 %v38_v25  ;;  %v207_v25 = vld [vmem:[%s2490_s0 + $0x1f8] sm:$0xff] }
  0x3e   :  { %137 = vmatpush.msrb.mxu3 %v36_v27  ;;  %v848_v27 = vld [vmem:[%s2494_s4 + $0x20] sm:$0xff] }
  0x40   :  { %138 = vmatpush.msrb.mxu3 %v34_v29 }
  0x42   :  { %139 = vmatpush.msrb.mxu3 %v32_v31  ;;  %v162_v31 = vld [vmem:[%s2490_s0 + $0x90] sm:$0xff] }
  0x43   :  { %140 = vmatmul.f32.vlgmr.msrb.gmra.mxu3 %v103_v33  ;;  %v830_v33 = vlaneseq }
  0x9e   :  { %v80_v34 = vpop.f32.mrf.mxu0  ;;  %v100_v35 = vpop.f32.mrf.mxu1 }
  0x9f   :  { %1201 = vmatpush.msk.msrb.mxu0 %vm403_vm0, %v80_v34  ;;  %1335 = vmatpush.msk.msra.mxu2 %vm403_vm0, %v80_v34 }
  0xa0   :  { %1336 = vmatpush.msk.msra.mxu3 %vm403_vm0, %v80_v34  ;;  %1266 = vmatpush.msk.msrb.mxu1 %vm403_vm0, %v100_v35  ;;  %v846_v34 = vld [vmem:[%s2494_s4 + $0x10] sm:$0xff] }
  0xa1   :  { %1202 = vmatmul.msk.f32.vlgmr.msrb.gmra.mxu0 %vm210_vm1, %v144_v36  ;;  %1267 = vmatmul.msk.f32.vlgmr.msrb.gmra.mxu1 %vm210_vm1, %v144_v36  ;;  %v1810_v36 = vand.u32 127, %v830_v33 }
  0xa2   :  { %1248 = vmatmul.msk.f32.vlgmr.msra.gmra.mxu2 %vm210_vm1, %v190_v37  ;;  %1249 = vmatmul.msk.f32.vlgmr.msra.gmra.mxu3 %vm210_vm1, %v191_v38 }
  0xa3   :  { %1337 = vmatpush.msk.msrb.mxu2 %vm403_vm0, %v100_v35  ;;  %v845_v35 = vld [vmem:[%s2494_s4 + $0x8] sm:$0xff] }
  0xa5   :  { %860 = vmatpush.msra.mxu2 %v859_v1  ;;  %v169_v1 = vld [vmem:[%s2490_s0 + $0xc8] sm:$0xff] }
  0xa7   :  { %861 = vmatpush.msra.mxu2 %v858_v5  ;;  %v170_v5 = vld [vmem:[%s2490_s0 + $0xd0] sm:$0xff] }
  0xa9   :  { %1203 = vmatmul.msk.f32.gmra.mxu0 %vm210_vm1, %v145_v39  ;;  %1268 = vmatmul.msk.f32.gmra.mxu1 %vm210_vm1, %v145_v39 }
  0xaa   :  { %1313 = vmatmul.msk.f32.vlgmr.msrb.gmra.mxu2 %vm210_vm1, %v190_v37  ;;  %1250 = vmatmul.msk.f32.gmra.mxu3 %vm210_vm1, %v192_v40  ;;  %v834_v37 = vpop.permute.xlu0 %833 }
  0xab   :  { %862 = vmatpush.msra.mxu2 %v857_v6  ;;  %vm838_vm2 = vcmp.eq.s32.totalorder %v834_v37, %v1810_v36  ;;  %v175_v37 = vld [vmem:[%s2490_s0 + $0xf8] sm:$0xff] }
  0xad   :  { %863 = vmatpush.msra.mxu2 %v856_v9  ;;  %v171_v9 = vld [vmem:[%s2490_s0 + $0xd8] sm:$0xff] }
  0xaf   :  { %864 = vmatpush.msra.mxu2 %v855_v11 }
  0xb1   :  { %1204 = vmatmul.msk.f32.gmra.mxu0 %vm210_vm1, %v146_v41  ;;  %1269 = vmatmul.msk.f32.gmra.mxu1 %vm210_vm1, %v146_v41  ;;  %v163_v41 = vld [vmem:[%s2490_s0 + $0x98] sm:$0xff] }
  0xb2   :  { %1314 = vmatmul.msk.f32.gmra.mxu2 %vm210_vm1, %v191_v38  ;;  %1251 = vmatmul.msk.f32.gmra.mxu3 %vm210_vm1, %v193_v42  ;;  %v844_v38 = vld [vmem:[%s2494_s4] sm:$0xff] }
  0xb3   :  { %865 = vmatpush.msra.mxu2 %v854_v12  ;;  %v172_v12 = vld [vmem:[%s2490_s0 + $0xe0] sm:$0xff] }
  0xb5   :  { %866 = vmatpush.msra.mxu2 %v853_v13 }
  0xb7   :  { %867 = vmatpush.msra.mxu2 %v852_v18  ;;  %v173_v18 = vld [vmem:[%s2490_s0 + $0xe8] sm:$0xff] }
  0xb9   :  { %1205 = vmatmul.msk.f32.gmra.mxu0 %vm210_vm1, %v147_v43  ;;  %1270 = vmatmul.msk.f32.gmra.mxu1 %vm210_vm1, %v147_v43  ;;  %v1383_v43 = vmov 1.0  }
  0xba   :  { %1315 = vmatmul.msk.f32.gmra.mxu2 %vm210_vm1, %v192_v40  ;;  %1252 = vmatmul.msk.f32.gmra.mxu3 %vm210_vm1, %v194_v46 }
  0xbb   :  { %868 = vmatpush.msra.mxu2 %v851_v19  ;;  %v121_v19 = vpop.f32.mrf.mxu3 }
  0xbd   :  { %869 = vmatpush.msra.mxu2 %v850_v20  ;;  %v837_v20 = vpop.permute.xlu0 %836 }
  0xbe   :  { %vm839_vm3 = vcmp.eq.s32.totalorder %v837_v20, %v1810_v36  ;;  %v891_v20 = vld [vmem:[%s2495_s5 + $0x40] sm:$0xff] }
  0xbf   :  { %870 = vmatpush.msra.mxu2 %v849_v26 }
  0xc1   :  { %1206 = vmatmul.msk.f32.gmra.mxu0 %vm210_vm1, %v148_v47  ;;  %1271 = vmatmul.msk.f32.gmra.mxu1 %vm210_vm1, %v148_v47 }
  0xc2   :  { %1316 = vmatmul.msk.f32.gmra.mxu2 %vm210_vm1, %v193_v42  ;;  %1253 = vmatmul.msk.f32.gmra.mxu3 %vm210_vm1, %v195_v48 }
  0xc3   :  { %871 = vmatpush.msra.mxu2 %v848_v27  ;;  %v174_v27 = vld [vmem:[%s2490_s0 + $0xf0] sm:$0xff] }
  0xc5   :  { %872 = vmatpush.msra.mxu2 %v847_v28 }
  0xc6   :  { %v1937_v28 = vpop.f32.mrf.mxu3 }
  0xc7   :  { %873 = vmatpush.msra.mxu2 %v846_v34  ;;  %v1946_v34 = vperm.slane %v121_v19, 0  ;;  %v892_v19 = vld [vmem:[%s2495_s5 + $0x48] sm:$0xff] }
  0xc9   :  { %1207 = vmatmul.msk.f32.gmra.mxu0 %vm210_vm1, %v149_v49  ;;  %1272 = vmatmul.msk.f32.gmra.mxu1 %vm210_vm1, %v149_v49 }
  0xca   :  { %1317 = vmatmul.msk.f32.gmra.mxu2 %vm210_vm1, %v194_v46  ;;  %1254 = vmatmul.msk.f32.gmra.mxu3 %vm210_vm1, %v196_v50  ;;  %v164_v46 = vld [vmem:[%s2490_s0 + $0xa0] sm:$0xff] }
  0xcb   :  { %874 = vmatpush.msra.mxu2 %v845_v35 }
  0xcd   :  { %875 = vmatpush.msra.mxu2 %v844_v38 }
  0xd1   :  { %1208 = vmatmul.msk.f32.gmra.mxu0 %vm210_vm1, %v150_v51  ;;  %1273 = vmatmul.msk.f32.gmra.mxu1 %vm210_vm1, %v150_v51 }
  0xd2   :  { %1318 = vmatmul.msk.f32.gmra.mxu2 %vm210_vm1, %v195_v48  ;;  %1255 = vmatmul.msk.f32.gmra.mxu3 %vm210_vm1, %v197_v52 }
  0xd9   :  { %1209 = vmatmul.msk.f32.gmra.mxu0 %vm210_vm1, %v151_v53  ;;  %1274 = vmatmul.msk.f32.gmra.mxu1 %vm210_vm1, %v151_v53 }
  0xda   :  { %1319 = vmatmul.msk.f32.gmra.mxu2 %vm210_vm1, %v196_v50  ;;  %1256 = vmatmul.msk.f32.gmra.mxu3 %vm210_vm1, %v198_v54  ;;  %v165_v50 = vld [vmem:[%s2490_s0 + $0xa8] sm:$0xff] }
  0xe1   :  { %1210 = vmatmul.msk.f32.gmra.mxu0 %vm210_vm1, %v152_v55  ;;  %1275 = vmatmul.msk.f32.gmra.mxu1 %vm210_vm1, %v152_v55 }
  0xe2   :  { %1320 = vmatmul.msk.f32.gmra.mxu2 %vm210_vm1, %v197_v52  ;;  %1257 = vmatmul.msk.f32.gmra.mxu3 %vm210_vm1, %v199_v56 }
  0xe9   :  { %1211 = vmatmul.msk.f32.gmra.mxu0 %vm210_vm1, %v153_v57  ;;  %1276 = vmatmul.msk.f32.gmra.mxu1 %vm210_vm1, %v153_v57  ;;  %v167_v57 = vld [vmem:[%s2490_s0 + $0xb8] sm:$0xff] }
  0xea   :  { %1321 = vmatmul.msk.f32.gmra.mxu2 %vm210_vm1, %v198_v54  ;;  %1258 = vmatmul.msk.f32.gmra.mxu3 %vm210_vm1, %v200_v58  ;;  %v166_v54 = vld [vmem:[%s2490_s0 + $0xb0] sm:$0xff] }
  0xf1   :  { %1212 = vmatmul.msk.f32.gmra.mxu0 %vm210_vm1, %v154_v59  ;;  %1277 = vmatmul.msk.f32.gmra.mxu1 %vm210_vm1, %v154_v59 }
  0xf2   :  { %1322 = vmatmul.msk.f32.gmra.mxu2 %vm210_vm1, %v199_v56  ;;  %1259 = vmatmul.msk.f32.gmra.mxu3 %vm210_vm1, %v201_v60 }
  0xf9   :  { %1213 = vmatmul.msk.f32.gmra.mxu0 %vm210_vm1, %v155_v61  ;;  %1278 = vmatmul.msk.f32.gmra.mxu1 %vm210_vm1, %v155_v61  ;;  %v168_v61 = vld [vmem:[%s2490_s0 + $0xc0] sm:$0xff] }
  0xfa   :  { %1323 = vmatmul.msk.f32.gmra.mxu2 %vm210_vm1, %v200_v58  ;;  %1260 = vmatmul.msk.f32.gmra.mxu3 %vm210_vm1, %v202_v63 }
 0x101   :  { %1214 = vmatmul.msk.f32.gmra.mxu0 %vm210_vm1, %v156_v62  ;;  %1279 = vmatmul.msk.f32.gmra.mxu1 %vm210_vm1, %v156_v62 }
 0x102   :  { %1324 = vmatmul.msk.f32.gmra.mxu2 %vm210_vm1, %v201_v60  ;;  %1261 = vmatmul.msk.f32.gmra.mxu3 %vm210_vm1, %v203_v2 }
 0x109   :  { %1215 = vmatmul.msk.f32.gmra.mxu0 %vm210_vm1, %v157_v0  ;;  %1280 = vmatmul.msk.f32.gmra.mxu1 %vm210_vm1, %v157_v0 }
 0x10a   :  { %1325 = vmatmul.msk.f32.gmra.mxu2 %vm210_vm1, %v202_v63  ;;  %1262 = vmatmul.msk.f32.gmra.mxu3 %vm210_vm1, %v204_v4 }
 0x111   :  { %1216 = vmatmul.msk.f32.gmra.mxu0 %vm210_vm1, %v158_v3  ;;  %1281 = vmatmul.msk.f32.gmra.mxu1 %vm210_vm1, %v158_v3 }
 0x112   :  { %1326 = vmatmul.msk.f32.gmra.mxu2 %vm210_vm1, %v203_v2  ;;  %1263 = vmatmul.msk.f32.gmra.mxu3 %vm210_vm1, %v205_v10 }
 0x119   :  { %1217 = vmatmul.msk.f32.gmra.mxu0 %vm210_vm1, %v159_v8  ;;  %1282 = vmatmul.msk.f32.gmra.mxu1 %vm210_vm1, %v159_v8 }
 0x11a   :  { %1327 = vmatmul.msk.f32.gmra.mxu2 %vm210_vm1, %v204_v4  ;;  %1264 = vmatmul.msk.f32.gmra.mxu3 %vm210_vm1, %v206_v17 }
 0x11e   :  { %v1744_v14 = vpop.f32.mrf.mxu0  ;;  %v1746_v15 = vpop.f32.mrf.mxu1 }
 0x11f   :  { %2499 = vst [vmem:[#allocation5_spill] sm:$0xff] %v1746_v15 }
 0x121   :  { %1218 = vmatmul.msk.f32.gmra.mxu0 %vm210_vm1, %v160_v16  ;;  %1283 = vmatmul.msk.f32.gmra.mxu1 %vm210_vm1, %v160_v16 }
 0x122   :  { %1328 = vmatmul.msk.f32.gmra.mxu2 %vm210_vm1, %v205_v10  ;;  %1265 = vmatmul.msk.f32.gmra.mxu3 %vm210_vm1, %v207_v25 }
 0x125   :  { %v1767_v21 = vpop.f32.mrf.mxu2 }
 0x126   :  { %v1769_v22 = vpop.f32.mrf.mxu0  ;;  %v1771_v23 = vpop.f32.mrf.mxu1 }
 0x127   :  { %2500 = vst [vmem:[#allocation6_spill] sm:$0xff] %v1771_v23 }
 0x129   :  { %1219 = vmatmul.msk.f32.gmra.mxu0 %vm210_vm1, %v161_v24  ;;  %1284 = vmatmul.msk.f32.gmra.mxu1 %vm210_vm1, %v161_v24 }
 0x12a   :  { %1329 = vmatmul.msk.f32.gmra.mxu2 %vm210_vm1, %v206_v17 }
 0x12d   :  { %v1792_v29 = vpop.f32.mrf.mxu2 }
 0x12e   :  { %2501 = vst [vmem:[#allocation7_spill] sm:$0xff] %v1792_v29  ;;  %v1794_v30 = vpop.f32.mrf.mxu0  ;;  %v1799_v32 = vpop.f32.mrf.mxu1 }
 0x12f   :  { %2502 = vst [vmem:[#allocation8_spill] sm:$0xff] %v1799_v32 }
 0x131   :  { %1220 = vmatmul.msk.f32.gmra.mxu0 %vm210_vm1, %v162_v31  ;;  %1285 = vmatmul.msk.f32.gmra.mxu1 %vm210_vm1, %v162_v31  ;;  %v898_v31 = vld [vmem:[%s2495_s5 + $0x78] sm:$0xff] }
 0x132   :  { %1330 = vmatmul.msk.f32.gmra.mxu2 %vm210_vm1, %v207_v25  ;;  %899 = vmatpush.msrb.mxu3 %v898_v31 }
 0x135   :  { %v1815_v39 = vpop.f32.mrf.mxu2 }
 0x136   :  { %2503 = vst [vmem:[#allocation9_spill] sm:$0xff] %v1815_v39  ;;  %v1817_v40 = vpop.f32.mrf.mxu0  ;;  %v1823_v42 = vpop.f32.mrf.mxu1  ;;  %v187_v39 = vld [vmem:[%s2490_s0 + $0x158] sm:$0xff] }
 0x137   :  { %2504 = vst [vmem:[#allocation10_spill] sm:$0xff] %v1823_v42 }
 0x139   :  { %1221 = vmatmul.msk.f32.gmra.mxu0 %vm210_vm1, %v163_v41  ;;  %1286 = vmatmul.msk.f32.gmra.mxu1 %vm210_vm1, %v163_v41  ;;  %v897_v41 = vld [vmem:[%s2495_s5 + $0x70] sm:$0xff] }
 0x13a   :  { %1333 = vmatmul.msk.f32.vlgmr.msra.gmra.mxu2 %vm838_vm2, %v1383_v43  ;;  %900 = vmatpush.msrb.mxu3 %v897_v41  ;;  %v889_v41 = vld [vmem:[%s2495_s5 + $0x30] sm:$0xff] }
 0x13d   :  { %v1828_v44 = vpop.f32.mrf.mxu2 }
 0x13e   :  { %2505 = vst [vmem:[#allocation11_spill] sm:$0xff] %v1828_v44  ;;  %v1830_v45 = vpop.f32.mrf.mxu0  ;;  %v1837_v47 = vpop.f32.mrf.mxu1 }
 0x13f   :  { %2506 = vst [vmem:[#allocation12_spill] sm:$0xff] %v1837_v47  ;;  %v189_v47 = vld [vmem:[%s2490_s0 + $0x168] sm:$0xff] }
 0x141   :  { %1222 = vmatmul.msk.f32.gmra.mxu0 %vm210_vm1, %v164_v46  ;;  %1287 = vmatmul.msk.f32.gmra.mxu1 %vm210_vm1, %v164_v46  ;;  %v896_v46 = vld [vmem:[%s2495_s5 + $0x68] sm:$0xff] }
 0x142   :  { %1334 = vmatmul.msk.f32.gmra.mxu2 %vm839_vm3, %v1383_v43  ;;  %v1957_v43 = vpop.f32.mrf.mxu3  ;;  %901 = vmatpush.msrb.mxu3 %v896_v46  ;;  %v888_v46 = vld [vmem:[%s2495_s5 + $0x28] sm:$0xff] }
 0x145   :  { %v1839_v48 = vpop.f32.mrf.mxu2 }
 0x146   :  { %2507 = vst [vmem:[#allocation13_spill] sm:$0xff] %v1839_v48  ;;  %v1841_v49 = vpop.f32.mrf.mxu0  ;;  %v1848_v51 = vpop.f32.mrf.mxu1 }
 0x147   :  { %2508 = vst [vmem:[#allocation14_spill] sm:$0xff] %v1848_v51 }
 0x149   :  { %1223 = vmatmul.msk.f32.gmra.mxu0 %vm210_vm1, %v165_v50  ;;  %1288 = vmatmul.msk.f32.gmra.mxu1 %vm210_vm1, %v165_v50  ;;  %v895_v50 = vld [vmem:[%s2495_s5 + $0x60] sm:$0xff] }
 0x14a   :  { %902 = vmatpush.msrb.mxu3 %v895_v50  ;;  %v887_v50 = vld [vmem:[%s2495_s5 + $0x20] sm:$0xff] }
 0x14d   :  { %v1850_v52 = vpop.f32.mrf.mxu2 }
 0x14e   :  { %2509 = vst [vmem:[#allocation15_spill] sm:$0xff] %v1850_v52  ;;  %v1852_v53 = vpop.f32.mrf.mxu0  ;;  %v1866_v58 = vpop.f32.mrf.mxu1 }
 0x14f   :  { %2511 = vst [vmem:[#allocation17_spill] sm:$0xff] %v1866_v58 }
 0x151   :  { %1224 = vmatmul.msk.f32.gmra.mxu0 %vm210_vm1, %v166_v54  ;;  %1289 = vmatmul.msk.f32.gmra.mxu1 %vm210_vm1, %v166_v54  ;;  %v894_v54 = vld [vmem:[%s2495_s5 + $0x58] sm:$0xff] }
 0x152   :  { %903 = vmatpush.msrb.mxu3 %v894_v54  ;;  %v886_v54 = vld [vmem:[%s2495_s5 + $0x18] sm:$0xff] }
 0x155   :  { %v1859_v55 = vpop.f32.mrf.mxu2 }
 0x156   :  { %2510 = vst [vmem:[#allocation16_spill] sm:$0xff] %v1859_v55  ;;  %v1861_v56 = vpop.f32.mrf.mxu0  ;;  %v1877_v62 = vpop.f32.mrf.mxu1 }
 0x157   :  { %2513 = vst [vmem:[#allocation19_spill] sm:$0xff] %v1877_v62 }
 0x159   :  { %1225 = vmatmul.msk.f32.gmra.mxu0 %vm210_vm1, %v167_v57  ;;  %1290 = vmatmul.msk.f32.gmra.mxu1 %vm210_vm1, %v167_v57 }
 0x15d   :  { %v1870_v59 = vpop.f32.mrf.mxu2 }
 0x15e   :  { %2512 = vst [vmem:[#allocation18_spill] sm:$0xff] %v1870_v59  ;;  %v1872_v60 = vpop.f32.mrf.mxu0  ;;  %v1890_v2 = vpop.f32.mrf.mxu1 }
 0x15f   :  { %2515 = vst [vmem:[#allocation21_spill] sm:$0xff] %v1890_v2 }
 0x161   :  { %1226 = vmatmul.msk.f32.gmra.mxu0 %vm210_vm1, %v168_v61  ;;  %1291 = vmatmul.msk.f32.gmra.mxu1 %vm210_vm1, %v168_v61 }
 0x165   :  { %v1881_v63 = vpop.f32.mrf.mxu2 }
 0x166   :  { %2514 = vst [vmem:[#allocation20_spill] sm:$0xff] %v1881_v63  ;;  %v1883_v0 = vpop.f32.mrf.mxu0  ;;  %v1901_v6 = vpop.f32.mrf.mxu1 }
 0x167   :  { %2516 = vst [vmem:[#allocation22_spill] sm:$0xff] %v1901_v6 }
 0x169   :  { %1227 = vmatmul.msk.f32.gmra.mxu0 %vm210_vm1, %v169_v1  ;;  %1292 = vmatmul.msk.f32.gmra.mxu1 %vm210_vm1, %v169_v1 }
 0x16d   :  { %v1892_v3 = vpop.f32.mrf.mxu2 }
 0x16e   :  { %v1894_v4 = vpop.f32.mrf.mxu0  ;;  %v1917_v13 = vpop.f32.mrf.mxu1 }
 0x16f   :  { %2517 = vst [vmem:[#allocation23_spill] sm:$0xff] %v1917_v13 }
 0x171   :  { %1228 = vmatmul.msk.f32.gmra.mxu0 %vm210_vm1, %v170_v5  ;;  %1293 = vmatmul.msk.f32.gmra.mxu1 %vm210_vm1, %v170_v5 }
 0x175   :  { %v1903_v7 = vpop.f32.mrf.mxu2 }
 0x176   :  { %v1905_v8 = vpop.f32.mrf.mxu0  ;;  %v1927_v24 = vpop.f32.mrf.mxu1 }
 0x177   :  { %2518 = vst [vmem:[#allocation24_spill] sm:$0xff] %v1927_v24 }
 0x179   :  { %1229 = vmatmul.msk.f32.gmra.mxu0 %vm210_vm1, %v171_v9  ;;  %1294 = vmatmul.msk.f32.gmra.mxu1 %vm210_vm1, %v171_v9  ;;  %v176_v9 = vld [vmem:[%s2490_s0 + $0x100] sm:$0xff] }
 0x17d   :  { %v1912_v10 = vpop.f32.mrf.mxu2 }
 0x17e   :  { %v463_v11 = vpop.f32.mrf.mxu0  ;;  %v1944_v33 = vpop.f32.mrf.mxu1 }
 0x17f   :  { %2519 = vst [vmem:[#allocation25_spill] sm:$0xff] %v1944_v33 }
 0x181   :  { %1230 = vmatmul.msk.f32.gmra.mxu0 %vm210_vm1, %v172_v12  ;;  %1295 = vmatmul.msk.f32.gmra.mxu1 %vm210_vm1, %v172_v12  ;;  %v893_v12 = vld [vmem:[%s2495_s5 + $0x50] sm:$0xff] }
 0x182   :  { %904 = vmatpush.msrb.mxu3 %v893_v12 }
 0x184   :  { %905 = vmatpush.msrb.mxu3 %v892_v19  ;;  %v885_v19 = vld [vmem:[%s2495_s5 + $0x10] sm:$0xff] }
 0x185   :  { %v1921_v16 = vpop.f32.mrf.mxu2 }
 0x186   :  { %v466_v17 = vpop.f32.mrf.mxu0  ;;  %v1971_v61 = vpop.f32.mrf.mxu1  ;;  %906 = vmatpush.msrb.mxu3 %v891_v20 }
 0x189   :  { %1231 = vmatmul.msk.f32.gmra.mxu0 %vm210_vm1, %v173_v18  ;;  %1296 = vmatmul.msk.f32.gmra.mxu1 %vm210_vm1, %v173_v18  ;;  %v467_v18 = vadd.f32 %v466_v17, %v1946_v34  ;;  %v890_v17 = vld [vmem:[%s2495_s5 + $0x38] sm:$0xff] }
 0x18a   :  { %907 = vmatpush.msrb.mxu3 %v890_v17  ;;  %v884_v17 = vld [vmem:[%s2495_s5 + $0x8] sm:$0xff] }
 0x18c   :  { %908 = vmatpush.msrb.mxu3 %v889_v41 }
 0x18d   :  { %v1932_v25 = vpop.f32.mrf.mxu2 }
 0x18e   :  { %v469_v26 = vpop.f32.mrf.mxu0  ;;  %909 = vmatpush.msrb.mxu3 %v888_v46 }
 0x18f   :  { %v470_v57 = vadd.f32 %v469_v26, %v1946_v34  ;;  %v1992_v26 = vpop.f32.mrf.mxu3 }
 0x190   :  { %910 = vmatpush.msrb.mxu3 %v887_v50  ;;  %v449_v50 = vadd.f32 %v1861_v56, %v1946_v34  ;;  %v443_v56 = vadd.f32 %v1841_v49, %v1946_v34  ;;  %v437_v49 = vadd.f32 %v1817_v40, %v1946_v34  ;;  %v431_v40 = vadd.f32 %v1769_v22, %v1946_v34  ;;  %v183_v22 = vld [vmem:[%s2490_s0 + $0x138] sm:$0xff] }
 0x191   :  { %1232 = vmatmul.msk.f32.gmra.mxu0 %vm210_vm1, %v174_v27  ;;  %1297 = vmatmul.msk.f32.gmra.mxu1 %vm210_vm1, %v174_v27  ;;  %v464_v27 = vadd.f32 %v463_v11, %v1946_v34  ;;  %v461_v11 = vadd.f32 %v1905_v8, %v1946_v34  ;;  %v458_v8 = vadd.f32 %v1894_v4, %v1946_v34 }
 0x192   :  { %911 = vmatpush.msrb.mxu3 %v886_v54  ;;  %v455_v4 = vadd.f32 %v1883_v0, %v1946_v34  ;;  %v452_v0 = vadd.f32 %v1872_v60, %v1946_v34  ;;  %v446_v54 = vadd.f32 %v1852_v53, %v1946_v34  ;;  %v440_v53 = vadd.f32 %v1830_v45, %v1946_v34 }
 0x193   :  { %v434_v45 = vadd.f32 %v1794_v30, %v1946_v34  ;;  %v569_v30 = vadd.f32 %v1957_v43, %v1946_v34  ;;  %v184_v43 = vld [vmem:[%s2490_s0 + $0x140] sm:$0xff] }
 0x194   :  { %912 = vmatpush.msrb.mxu3 %v885_v19  ;;  %v180_v19 = vld [vmem:[%s2490_s0 + $0x120] sm:$0xff] }
 0x195   :  { %v1948_v35 = vpop.f32.mrf.mxu2 }
 0x196   :  { %v472_v36 = vpop.f32.mrf.mxu0  ;;  %913 = vmatpush.msrb.mxu3 %v884_v17 }
 0x197   :  { %v473_v38 = vadd.f32 %v472_v36, %v1946_v34 }
 0x199   :  { %1233 = vmatmul.msk.f32.gmra.mxu0 %vm210_vm1, %v175_v37  ;;  %1298 = vmatmul.msk.f32.gmra.mxu1 %vm210_vm1, %v175_v37  ;;  %v177_v37 = vld [vmem:[%s2490_s0 + $0x108] sm:$0xff] }
 0x19a   :  { %922 = vmatpush.xpose.msrb.mxu2 %v473_v38  ;;  %v2005_v38 = vpop.f32.mrf.mxu1 }
 0x19d   :  { %v1973_v1 = vpop.f32.mrf.mxu2 }
 0x19e   :  { %923 = vmatpush.xpose.msrb.mxu2 %v470_v57  ;;  %v1975_v5 = vpop.f32.mrf.mxu0  ;;  %v2025_v57 = vpop.f32.mrf.mxu3 }
 0x1a1   :  { %1234 = vmatmul.msk.f32.gmra.mxu0 %vm210_vm1, %v176_v9  ;;  %1299 = vmatmul.msk.f32.gmra.mxu1 %vm210_vm1, %v176_v9 }
 0x1a2   :  { %924 = vmatpush.xpose.msrb.mxu2 %v467_v18  ;;  %v178_v18 = vld [vmem:[%s2490_s0 + $0x110] sm:$0xff]  ;;  %v2039_v20 = vpop.f32.mrf.mxu1 }
 0x1a5   :  { %v1998_v31 = vpop.f32.mrf.mxu2 }
 0x1a6   :  { %925 = vmatpush.xpose.msrb.mxu2 %v464_v27  ;;  %v2000_v36 = vpop.f32.mrf.mxu0  ;;  %v883_v27 = vld [vmem:[%s2495_s5] sm:$0xff]  ;;  %v2058_v46 = vpop.f32.mrf.mxu3 }
 0x1a7   :  { %914 = vmatpush.msrb.mxu3 %v883_v27 }
 0x1a9   :  { %1235 = vmatmul.msk.f32.gmra.mxu0 %vm210_vm1, %v177_v37  ;;  %1300 = vmatmul.msk.f32.gmra.mxu1 %vm210_vm1, %v177_v37 }
 0x1aa   :  { %926 = vmatpush.xpose.msrb.mxu2 %v461_v11  ;;  %v179_v11 = vld [vmem:[%s2490_s0 + $0x118] sm:$0xff]  ;;  %v2064_v60 = vpop.f32.mrf.mxu1 }
 0x1ad   :  { %v2027_v9 = vpop.f32.mrf.mxu2 }
 0x1ae   :  { %927 = vmatpush.xpose.msrb.mxu2 %v458_v8  ;;  %v2029_v12 = vpop.f32.mrf.mxu0 }
 0x1b1   :  { %1236 = vmatmul.msk.f32.gmra.mxu0 %vm210_vm1, %v178_v18  ;;  %1301 = vmatmul.msk.f32.gmra.mxu1 %vm210_vm1, %v178_v18 }
 0x1b2   :  { %928 = vmatpush.xpose.msrb.mxu2 %v455_v4  ;;  %v2075_v4 = vpop.f32.mrf.mxu3  ;;  %v2081_v17 = vpop.f32.mrf.mxu1 }
 0x1b5   :  { %v2051_v37 = vpop.f32.mrf.mxu2 }
 0x1b6   :  { %929 = vmatpush.xpose.msrb.mxu2 %v452_v0  ;;  %v2053_v41 = vpop.f32.mrf.mxu0  ;;  %v181_v0 = vld [vmem:[%s2490_s0 + $0x128] sm:$0xff] }
 0x1b9   :  { %1237 = vmatmul.msk.f32.gmra.mxu0 %vm210_vm1, %v179_v11  ;;  %1302 = vmatmul.msk.f32.gmra.mxu1 %vm210_vm1, %v179_v11 }
 0x1ba   :  { %930 = vmatpush.xpose.msrb.mxu2 %v449_v50  ;;  %v2092_v11 = vpop.f32.mrf.mxu3 }
 0x1bd   :  { %v877_v8 = vpop.f32.mrf.mxu2 }
 0x1be   :  { %931 = vmatpush.xpose.msrb.mxu2 %v446_v54  ;;  %v2068_v18 = vpop.f32.mrf.mxu0  ;;  %915 = vmatmul.f32.vlgmr.msrb.gmra.mxu3 %v877_v8  ;;  %v182_v54 = vld [vmem:[%s2490_s0 + $0x130] sm:$0xff]  ;;  %v2101_v8 = vpop.f32.mrf.mxu1 }
 0x1c1   :  { %1238 = vmatmul.msk.f32.gmra.mxu0 %vm210_vm1, %v180_v19  ;;  %1303 = vmatmul.msk.f32.gmra.mxu1 %vm210_vm1, %v180_v19  ;;  %v428_v19 = vadd.f32 %v1744_v14, %v1946_v34 }
 0x1c2   :  { %932 = vmatpush.xpose.msrb.mxu2 %v443_v56  ;;  %v2111_v56 = vpop.f32.mrf.mxu3 }
 0x1c5   :  { %v880_v58 = vpop.f32.mrf.mxu2 }
 0x1c6   :  { %933 = vmatpush.xpose.msrb.mxu2 %v440_v53  ;;  %v2083_v27 = vpop.f32.mrf.mxu0  ;;  %918 = vmatmul.f32.gmra.mxu3 %v880_v58 }
 0x1c9   :  { %1239 = vmatmul.msk.f32.gmra.mxu0 %vm210_vm1, %v181_v0  ;;  %1304 = vmatmul.msk.f32.gmra.mxu1 %vm210_vm1, %v181_v0  ;;  %v566_v0 = vadd.f32 %v1767_v21, %v1946_v34 }
 0x1ca   :  { %934 = vmatpush.xpose.msrb.mxu2 %v437_v49  ;;  %v2120_v49 = vpop.f32.mrf.mxu1 }
 0x1ce   :  { %935 = vmatpush.xpose.msrb.mxu2 %v434_v45  ;;  %v2096_v50 = vpop.f32.mrf.mxu0  ;;  %v2127_v45 = vpop.f32.mrf.mxu3 }
 0x1d1   :  { %1240 = vmatmul.msk.f32.gmra.mxu0 %vm210_vm1, %v182_v54  ;;  %1305 = vmatmul.msk.f32.gmra.mxu1 %vm210_vm1, %v182_v54 }
 0x1d2   :  { %936 = vmatpush.xpose.msrb.mxu2 %v431_v40  ;;  %v2131_v54 = vpop.f32.mrf.mxu1  ;;  %v185_v40 = vld [vmem:[%s2490_s0 + $0x148] sm:$0xff] }
 0x1d6   :  { %937 = vmatpush.xpose.msrb.mxu2 %v428_v19  ;;  %v2113_v53 = vpop.f32.mrf.mxu0 }
 0x1d9   :  { %1241 = vmatmul.msk.f32.gmra.mxu0 %vm210_vm1, %v183_v22  ;;  %1306 = vmatmul.msk.f32.gmra.mxu1 %vm210_vm1, %v183_v22 }
 0x1da   :  { %962 = vmatpush.xpose.msra.mxu2 %v569_v30  ;;  %v2136_v30 = vpop.f32.mrf.mxu3  ;;  %v2140_v19 = vpop.f32.mrf.mxu1 }
 0x1de   :  { %963 = vmatpush.xpose.msra.mxu2 %v566_v0  ;;  %v499_v14 = vpop.f32.mrf.mxu0  ;;  %v186_v0 = vld [vmem:[%s2490_s0 + $0x150] sm:$0xff] }
 0x1e1   :  { %1242 = vmatmul.msk.f32.gmra.mxu0 %vm210_vm1, %v184_v43  ;;  %1307 = vmatmul.msk.f32.gmra.mxu1 %vm210_vm1, %v184_v43 }
 0x1e2   :  { %v2147_v43 = vpop.f32.mrf.mxu3  ;;  %v2152_v15 = vpop.f32.mrf.mxu1 }
 0x1e6   :  { %v502_v21 = vpop.f32.mrf.mxu0 }
 0x1e7   :  { %v503_v63 = vadd.f32 %v502_v21, %v1946_v34 }
 0x1e9   :  { %1243 = vmatmul.msk.f32.gmra.mxu0 %vm210_vm1, %v185_v40  ;;  %1308 = vmatmul.msk.f32.gmra.mxu1 %vm210_vm1, %v185_v40 }
 0x1ea   :  { %v2156_v40 = vpop.f32.mrf.mxu3  ;;  %v2161_v32 = vpop.f32.mrf.mxu1 }
 0x1ee   :  { %v505_v22 = vpop.f32.mrf.mxu0 }
 0x1f1   :  { %1244 = vmatmul.msk.f32.gmra.mxu0 %vm210_vm1, %v186_v0  ;;  %1309 = vmatmul.msk.f32.gmra.mxu1 %vm210_vm1, %v186_v0  ;;  %v188_v0 = vld [vmem:[%s2490_s0 + $0x160] sm:$0xff] }
 0x1f2   :  { %v2168_v51 = vpop.f32.mrf.mxu3 }
 0x1f6   :  { %v508_v29 = vpop.f32.mrf.mxu0 }
 0x1f9   :  { %1245 = vmatmul.msk.f32.gmra.mxu0 %vm210_vm1, %v187_v39  ;;  %1310 = vmatmul.msk.f32.gmra.mxu1 %vm210_vm1, %v187_v39  ;;  %v2172_v39 = vpop.f32.mrf.mxu1 }
 0x1fa   :  { %v2174_v62 = vpop.f32.mrf.mxu3 }
 0x1fe   :  { %v511_v23 = vpop.f32.mrf.mxu0 }
 0x1ff   :  { %v512_v58 = vadd.f32 %v511_v23, %v1946_v34  ;;  %v500_v23 = vadd.f32 %v499_v14, %v1946_v34 }
 0x201   :  { %1246 = vmatmul.msk.f32.gmra.mxu0 %vm210_vm1, %v188_v0  ;;  %1311 = vmatmul.msk.f32.gmra.mxu1 %vm210_vm1, %v188_v0  ;;  %v2176_v48 = vpop.f32.mrf.mxu1 }
 0x202   :  { %v607_v52 = vpop.f32.mrf.mxu3 }
 0x206   :  { %v514_v42 = vpop.f32.mrf.mxu0 }
 0x207   :  { %v515_v13 = vadd.f32 %v514_v42, %v1946_v34 }
 0x209   :  { %1247 = vmatmul.msk.f32.gmra.mxu0 %vm210_vm1, %v189_v47  ;;  %1312 = vmatmul.msk.f32.gmra.mxu1 %vm210_vm1, %v189_v47  ;;  %v2182_v47 = vpop.f32.mrf.mxu1 }
 0x20a   :  { %v610_v59 = vpop.f32.mrf.mxu3 }
 0x20e   :  { %v517_v44 = vpop.f32.mrf.mxu0 }
 0x20f   :  { %v518_v6 = vadd.f32 %v517_v44, %v1946_v34  ;;  %v506_v44 = vadd.f32 %v505_v22, %v1946_v34  ;;  %v494_v22 = vadd.f32 %v2096_v50, %v1946_v34  ;;  %v485_v50 = vadd.f32 %v2053_v41, %v1946_v34 }
 0x212   :  { %v613_v42 = vpop.f32.mrf.mxu3 }
 0x216   :  { %v520_v0 = vpop.f32.mrf.mxu0 }
 0x217   :  { %v521_v2 = vadd.f32 %v520_v0, %v1946_v34  ;;  %v509_v0 = vadd.f32 %v508_v29, %v1946_v34  ;;  %v497_v29 = vadd.f32 %v2113_v53, %v1946_v34 }
 0x219   :  { %942 = vmatpush.xpose.msra.mxu3 %v521_v2  ;;  %v2189_v2 = vpop.f32.mrf.mxu1 }
 0x21d   :  { %943 = vmatpush.xpose.msra.mxu3 %v518_v6 }
 0x21e   :  { %v2180_v55 = vpop.f32.mrf.mxu0 }
 0x221   :  { %944 = vmatpush.xpose.msra.mxu3 %v515_v13  ;;  %v2196_v13 = vpop.f32.mrf.mxu1 }
 0x225   :  { %945 = vmatpush.xpose.msra.mxu3 %v512_v58 }
 0x226   :  { %v2186_v24 = vpop.f32.mrf.mxu0 }
 0x229   :  { %946 = vmatpush.xpose.msra.mxu3 %v509_v0  ;;  %v616_v0 = vpop.f32.mrf.mxu3 }
 0x22d   :  { %947 = vmatpush.xpose.msra.mxu3 %v506_v44  ;;  %v2204_v44 = vpop.f32.mrf.mxu1 }
 0x22e   :  { %v2192_v6 = vpop.f32.mrf.mxu0 }
 0x231   :  { %948 = vmatpush.xpose.msra.mxu3 %v503_v63  ;;  %v491_v63 = vadd.f32 %v2083_v27, %v1946_v34 }
 0x235   :  { %949 = vmatpush.xpose.msra.mxu3 %v500_v23  ;;  %v488_v23 = vadd.f32 %v2068_v18, %v1946_v34  ;;  %v476_v18 = vadd.f32 %v1975_v5, %v1946_v34  ;;  %v605_v5 = vadd.f32 %v2174_v62, %v1946_v34  ;;  %v593_v62 = vadd.f32 %v2136_v30, %v1946_v34 }
 0x236   :  { %v2198_v58 = vpop.f32.mrf.mxu0  ;;  %v581_v30 = vadd.f32 %v2075_v4, %v1946_v34  ;;  %v2269_v4 = vperm.slane %v1937_v28, 0 }
 0x238   :  { %v724_v28 = vadd.f32 %v2204_v44, %v2269_v4  ;;  %v715_v44 = vadd.f32 %v2182_v47, %v2269_v4  ;;  %v703_v47 = vadd.f32 %v2152_v15, %v2269_v4  ;;  %v691_v15 = vadd.f32 %v2101_v8, %v2269_v4 }
 0x239   :  { %950 = vmatpush.xpose.msra.mxu3 %v497_v29  ;;  %v2216_v29 = vpop.f32.mrf.mxu1  ;;  %v826_v8 = vadd.f32 %v2051_v37, %v2269_v4  ;;  %v527_v37 = vadd.f32 %v2186_v24, %v1946_v34  ;;  %v805_v24 = vadd.f32 %v1912_v10, %v2269_v4  ;;  %v799_v10 = vadd.f32 %v1892_v3, %v2269_v4 }
 0x23d   :  { %951 = vmatpush.xpose.msra.mxu3 %v494_v22  ;;  %v482_v22 = vadd.f32 %v2029_v12, %v1946_v34 }
 0x23e   :  { %v2206_v21 = vpop.f32.mrf.mxu0 }
 0x241   :  { %952 = vmatpush.xpose.msra.mxu3 %v491_v63  ;;  %v916_v14 = vpop.f32.mrf.mxu3  ;;  %v479_v63 = vadd.f32 %v2000_v36, %v1946_v34  ;;  %v729_v33 = vpop.f32.mrf.mxu1 }
 0x242   :  { %938 = vmatmul.f32.vlgmr.msrb.gmra.mxu2 %v916_v14 }
 0x245   :  { %953 = vmatpush.xpose.msra.mxu3 %v488_v23  ;;  %v617_v23 = vadd.f32 %v616_v0, %v1946_v34 }
 0x246   :  { %v2212_v53 = vpop.f32.mrf.mxu0 }
 0x249   :  { %954 = vmatpush.xpose.msra.mxu3 %v485_v50  ;;  %v614_v50 = vadd.f32 %v613_v42, %v1946_v34  ;;  %v2230_v12 = vpop.f32.mrf.mxu1  ;;  %v602_v42 = vadd.f32 %v2168_v51, %v1946_v34  ;;  %v590_v51 = vadd.f32 %v2127_v45, %v1946_v34 }
 0x24d   :  { %955 = vmatpush.xpose.msra.mxu3 %v482_v22  ;;  %v611_v22 = vadd.f32 %v610_v59, %v1946_v34 }
 0x24e   :  { %v2220_v27 = vpop.f32.mrf.mxu0 }
 0x251   :  { %956 = vmatpush.xpose.msra.mxu3 %v479_v63  ;;  %v608_v63 = vadd.f32 %v607_v52, %v1946_v34  ;;  %v2236_v0 = vpop.f32.mrf.mxu1  ;;  %v596_v52 = vadd.f32 %v2147_v43, %v1946_v34  ;;  %v584_v43 = vadd.f32 %v2092_v11, %v1946_v34  ;;  %v575_v11 = vadd.f32 %v2025_v57, %v1946_v34 }
 0x255   :  { %957 = vmatpush.xpose.msra.mxu3 %v476_v18 }
 0x256   :  { %v2227_v41 = vpop.f32.mrf.mxu0 }
 0x258   :  { %958 = vmatmul.f32.vlgmr.msra.gmra.mxu3 %v916_v14  ;;  %v599_v14 = vadd.f32 %v2156_v40, %v1946_v34  ;;  %v587_v40 = vadd.f32 %v2111_v56, %v1946_v34 }
 0x259   :  { %982 = vmatpush.xpose.msrb.mxu3 %v617_v23  ;;  %v2242_v23 = vpop.f32.mrf.mxu1 }
 0x25d   :  { %983 = vmatpush.xpose.msrb.mxu3 %v614_v50 }
 0x25e   :  { %v547_v36 = vpop.f32.mrf.mxu0 }
 0x261   :  { %984 = vmatpush.xpose.msrb.mxu3 %v611_v22  ;;  %v2250_v22 = vpop.f32.mrf.mxu1 }
 0x265   :  { %985 = vmatpush.xpose.msrb.mxu3 %v608_v63 }
 0x266   :  { %v550_v18 = vpop.f32.mrf.mxu0 }
 0x269   :  { %986 = vmatpush.xpose.msrb.mxu3 %v605_v5  ;;  %v2256_v5 = vpop.f32.mrf.mxu1 }
 0x26d   :  { %987 = vmatpush.xpose.msrb.mxu3 %v602_v42 }
 0x26e   :  { %v553_v59 = vpop.f32.mrf.mxu0 }
 0x26f   :  { %v554_v57 = vadd.f32 %v553_v59, %v1946_v34  ;;  %v548_v59 = vadd.f32 %v547_v36, %v1946_v34  ;;  %v694_v36 = vadd.f32 %v2120_v49, %v2269_v4  ;;  %v533_v49 = vadd.f32 %v2198_v58, %v1946_v34 }
 0x270   :  { %v817_v58 = vadd.f32 %v1973_v1, %v2269_v4  ;;  %v808_v1 = vadd.f32 %v1921_v16, %v2269_v4  ;;  %v676_v16 = vadd.f32 %v1971_v61, %v2269_v4 }
 0x271   :  { %988 = vmatpush.xpose.msrb.mxu3 %v599_v14  ;;  %v578_v14 = vadd.f32 %v2058_v46, %v1946_v34  ;;  %v730_v46 = vadd.f32 %v729_v33, %v2269_v4  ;;  %v721_v33 = vadd.f32 %v2196_v13, %v2269_v4  ;;  %v709_v13 = vadd.f32 %v2172_v39, %v2269_v4 }
 0x272   :  { %v700_v39 = vadd.f32 %v2140_v19, %v2269_v4  ;;  %v536_v19 = vadd.f32 %v2206_v21, %v1946_v34  ;;  %v823_v21 = vadd.f32 %v2027_v9, %v2269_v4  ;;  %v814_v9 = vadd.f32 %v1948_v35, %v2269_v4 }
 0x275   :  { %989 = vmatpush.xpose.msrb.mxu3 %v596_v52  ;;  %v2266_v52 = vpop.f32.mrf.mxu1 }
 0x276   :  { %v556_v50 = vpop.f32.mrf.mxu0 }
 0x279   :  { %990 = vmatpush.xpose.msrb.mxu3 %v593_v62  ;;  %v557_v62 = vadd.f32 %v556_v50, %v1946_v34  ;;  %v551_v50 = vadd.f32 %v550_v18, %v1946_v34  ;;  %v545_v18 = vadd.f32 %v2227_v41, %v1946_v34  ;;  %v697_v41 = vadd.f32 %v2131_v54, %v2269_v4 }
 0x27a   :  { %v688_v54 = vadd.f32 %v2081_v17, %v2269_v4  ;;  %v530_v17 = vadd.f32 %v2192_v6, %v1946_v34  ;;  %v811_v6 = vadd.f32 %v1932_v25, %v2269_v4  ;;  %v679_v25 = vadd.f32 %v2005_v38, %v2269_v4  ;;  %v2521_v38 = vld [vmem:[#allocation20_spill] sm:$0xff] }
 0x27d   :  { %991 = vmatpush.xpose.msrb.mxu3 %v590_v51  ;;  %v572_v51 = vadd.f32 %v1992_v26, %v1946_v34  ;;  %v2285_v26 = vpop.f32.mrf.mxu1 }
 0x27e   :  { %v559_v63 = vpop.f32.mrf.mxu0 }
 0x27f   :  { %v560_v56 = vadd.f32 %v559_v63, %v1946_v34  ;;  %v2278_v63 = vpop.f32.mrf.mxu3 }
 0x281   :  { %992 = vmatpush.xpose.msrb.mxu3 %v587_v40  ;;  %v727_v40 = vadd.f32 %v2216_v29, %v2269_v4  ;;  %v718_v29 = vadd.f32 %v2189_v2, %v2269_v4  ;;  %v706_v2 = vadd.f32 %v2161_v32, %v2269_v4  ;;  %v539_v32 = vadd.f32 %v2212_v53, %v1946_v34 }
 0x282   :  { %v685_v53 = vadd.f32 %v2064_v60, %v2269_v4 }
 0x285   :  { %993 = vmatpush.xpose.msrb.mxu3 %v584_v43  ;;  %v712_v43 = vadd.f32 %v2176_v48, %v2269_v4  ;;  %v542_v48 = vadd.f32 %v2220_v27, %v1946_v34 }
 0x286   :  { %v562_v42 = vpop.f32.mrf.mxu0 }
 0x287   :  { %v563_v45 = vadd.f32 %v562_v42, %v1946_v34  ;;  %v820_v42 = vadd.f32 %v1998_v31, %v2269_v4  ;;  %v524_v31 = vadd.f32 %v2180_v55, %v1946_v34  ;;  %v802_v55 = vadd.f32 %v1903_v7, %v2269_v4  ;;  %v2520_v34 = vld [vmem:[#allocation25_spill] sm:$0xff]  ;;  %v2522_v7 = vld [vmem:[#allocation24_spill] sm:$0xff] }
 0x289   :  { %994 = vmatpush.xpose.msrb.mxu3 %v581_v30  ;;  %964 = vmatpush.xpose.msra.mxu2 %v563_v45  ;;  %v2301_v30 = vpop.f32.mrf.mxu1  ;;  %v682_v45 = vadd.f32 %v2039_v20, %v2269_v4  ;;  %v673_v20 = vadd.f32 %v2520_v34, %v2269_v4 }
 0x28d   :  { %995 = vmatpush.xpose.msrb.mxu3 %v578_v14  ;;  %965 = vmatpush.xpose.msra.mxu2 %v560_v56  ;;  %v796_v14 = vadd.f32 %v2521_v38, %v2269_v4  ;;  %v670_v56 = vadd.f32 %v2522_v7, %v2269_v4  ;;  %v754_v7 = vadd.f32 %v2301_v30, %v2269_v4 }
 0x28e   :  { %v739_v30 = vadd.f32 %v2242_v23, %v2269_v4 }
 0x291   :  { %996 = vmatpush.xpose.msrb.mxu3 %v575_v11  ;;  %966 = vmatpush.xpose.msra.mxu2 %v557_v62  ;;  %v2319_v27 = vpop.f32.mrf.mxu1  ;;  %v2523_v11 = vld [vmem:[#allocation18_spill] sm:$0xff]  ;;  %v2524_v62 = vld [vmem:[#allocation23_spill] sm:$0xff] }
 0x292   :  { %v793_v61 = vadd.f32 %v2523_v11, %v2269_v4  ;;  %v667_v3 = vadd.f32 %v2524_v62, %v2269_v4 }
 0x295   :  { %997 = vmatpush.xpose.msrb.mxu3 %v572_v51  ;;  %967 = vmatpush.xpose.msra.mxu2 %v554_v57  ;;  %v2525_v51 = vld [vmem:[#allocation16_spill] sm:$0xff] }
 0x298   :  { %998 = vmatmul.f32.vlgmr.msrb.gmra.mxu3 %v2278_v63 }
 0x299   :  { %1082 = vmatpush.msra.mxu3 %v730_v46  ;;  %968 = vmatpush.xpose.msra.mxu2 %v551_v50  ;;  %v2335_v60 = vpop.f32.mrf.mxu1  ;;  %v790_v46 = vadd.f32 %v2525_v51, %v2269_v4  ;;  %v2528_v50 = vld [vmem:[#allocation21_spill] sm:$0xff] }
 0x29a   :  { %v760_v38 = vadd.f32 %v2335_v60, %v2269_v4  ;;  %v745_v60 = vadd.f32 %v2256_v5, %v2269_v4 }
 0x29b   :  { %1083 = vmatpush.msra.mxu3 %v727_v40  ;;  %v2526_v40 = vld [vmem:[#allocation22_spill] sm:$0xff] }
 0x29c   :  { %v664_v57 = vadd.f32 %v2526_v40, %v2269_v4 }
 0x29d   :  { %1084 = vmatpush.msra.mxu3 %v724_v28  ;;  %969 = vmatpush.xpose.msra.mxu2 %v548_v59  ;;  %v2527_v28 = vld [vmem:[#allocation15_spill] sm:$0xff] }
 0x29f   :  { %1085 = vmatpush.msra.mxu3 %v721_v33  ;;  %v787_v33 = vadd.f32 %v2527_v28, %v2269_v4 }
 0x2a1   :  { %1086 = vmatpush.msra.mxu3 %v718_v29  ;;  %970 = vmatpush.xpose.msra.mxu2 %v545_v18  ;;  %v2355_v35 = vpop.f32.mrf.mxu1  ;;  %v661_v29 = vadd.f32 %v2528_v50, %v2269_v4  ;;  %v2531_v18 = vld [vmem:[#allocation11_spill] sm:$0xff] }
 0x2a3   :  { %1087 = vmatpush.msra.mxu3 %v715_v44  ;;  %v2529_v44 = vld [vmem:[#allocation13_spill] sm:$0xff] }
 0x2a4   :  { %v784_v59 = vadd.f32 %v2529_v44, %v2269_v4 }
 0x2a5   :  { %1088 = vmatpush.msra.mxu3 %v712_v43  ;;  %971 = vmatpush.xpose.msra.mxu2 %v542_v48  ;;  %v2530_v43 = vld [vmem:[#allocation19_spill] sm:$0xff] }
 0x2a7   :  { %1089 = vmatpush.msra.mxu3 %v709_v13  ;;  %v658_v13 = vadd.f32 %v2530_v43, %v2269_v4 }
 0x2a9   :  { %1090 = vmatpush.msra.mxu3 %v706_v2  ;;  %972 = vmatpush.xpose.msra.mxu2 %v539_v32  ;;  %v781_v2 = vadd.f32 %v2531_v18, %v2269_v4  ;;  %v2534_v32 = vld [vmem:[#allocation12_spill] sm:$0xff] }
 0x2ab   :  { %1091 = vmatpush.msra.mxu3 %v703_v47  ;;  %v2532_v47 = vld [vmem:[#allocation17_spill] sm:$0xff] }
 0x2ac   :  { %v655_v48 = vadd.f32 %v2532_v47, %v2269_v4 }
 0x2ad   :  { %1092 = vmatpush.msra.mxu3 %v700_v39  ;;  %973 = vmatpush.xpose.msra.mxu2 %v536_v19  ;;  %v2533_v39 = vld [vmem:[#allocation14_spill] sm:$0xff] }
 0x2ae   :  { %v2535_v19 = vld [vmem:[#allocation10_spill] sm:$0xff] }
 0x2af   :  { %1093 = vmatpush.msra.mxu3 %v697_v41  ;;  %v652_v41 = vadd.f32 %v2533_v39, %v2269_v4 }
 0x2b1   :  { %1094 = vmatpush.msra.mxu3 %v694_v36  ;;  %974 = vmatpush.xpose.msra.mxu2 %v533_v49  ;;  %v649_v36 = vadd.f32 %v2534_v32, %v2269_v4 }
 0x2b3   :  { %1095 = vmatpush.msra.mxu3 %v691_v15 }
 0x2b5   :  { %1096 = vmatpush.msra.mxu3 %v688_v54  ;;  %975 = vmatpush.xpose.msra.mxu2 %v530_v17  ;;  %v646_v54 = vadd.f32 %v2535_v19, %v2269_v4 }
 0x2b7   :  { %1097 = vmatpush.msra.mxu3 %v685_v53  ;;  %v2536_v53 = vld [vmem:[#allocation8_spill] sm:$0xff] }
 0x2b8   :  { %v643_v49 = vadd.f32 %v2536_v53, %v2269_v4  ;;  %v1157_v53 = vld [vmem:[%s2497_s7 + $0x78] sm:$0xff] }
 0x2b9   :  { %1122 = vmatpush.msrb.mxu3 %v826_v8  ;;  %976 = vmatpush.xpose.msra.mxu2 %v527_v37 }
 0x2bb   :  { %1123 = vmatpush.msrb.mxu3 %v823_v21  ;;  %v2537_v21 = vld [vmem:[#allocation6_spill] sm:$0xff] }
 0x2bc   :  { %v640_v17 = vadd.f32 %v2537_v21, %v2269_v4  ;;  %v1154_v21 = vld [vmem:[%s2497_s7 + $0x60] sm:$0xff] }
 0x2bd   :  { %1124 = vmatpush.msrb.mxu3 %v820_v42  ;;  %977 = vmatpush.xpose.msra.mxu2 %v524_v31 }
 0x2bf   :  { %1125 = vmatpush.msrb.mxu3 %v817_v58  ;;  %v2538_v58 = vld [vmem:[#allocation5_spill] sm:$0xff] }
 0x2c0   :  { %978 = vmatmul.f32.vlgmr.msra.gmra.mxu2 %v2278_v63  ;;  %v765_v63 = vpop.f32.mrf.mxu1  ;;  %v637_v37 = vadd.f32 %v2538_v58, %v2269_v4  ;;  %v1151_v58 = vld [vmem:[%s2497_s7 + $0x48] sm:$0xff] }
 0x2c1   :  { %1126 = vmatpush.msrb.mxu3 %v814_v9  ;;  %1062 = vmatpush.msrb.mxu2 %v682_v45  ;;  %v766_v34 = vadd.f32 %v765_v63, %v2269_v4 }
 0x2c3   :  { %1127 = vmatpush.msrb.mxu3 %v811_v6  ;;  %1063 = vmatpush.msrb.mxu2 %v679_v25  ;;  %v2539_v6 = vld [vmem:[#allocation9_spill] sm:$0xff] }
 0x2c4   :  { %v778_v31 = vadd.f32 %v2539_v6, %v2269_v4  ;;  %v1149_v6 = vld [vmem:[%s2497_s7 + $0x38] sm:$0xff] }
 0x2c5   :  { %1128 = vmatpush.msrb.mxu3 %v808_v1  ;;  %1064 = vmatpush.msrb.mxu2 %v676_v16  ;;  %v939_v8 = vpop.f32.mrf.mxu2 }
 0x2c6   :  { %v1002_v42 = vmul.f32 0.17677669, %v939_v8  ;;  %v1155_v8 = vld [vmem:[%s2497_s7 + $0x68] sm:$0xff] }
 0x2c7   :  { %1129 = vmatpush.msrb.mxu3 %v805_v24  ;;  %1065 = vmatpush.msrb.mxu2 %v673_v20  ;;  %v2540_v24 = vld [vmem:[#allocation7_spill] sm:$0xff]  ;;  %v763_v20 = vadd.f32 %v2355_v35, %v2269_v4  ;;  %v748_v35 = vadd.f32 %v2266_v52, %v2269_v4  ;;  %v733_v52 = vadd.f32 %v2230_v12, %v2269_v4 }
 0x2c8   :  { %v768_v15 = vpop.f32.mrf.mxu1  ;;  %v775_v25 = vadd.f32 %v2540_v24, %v2269_v4 }
 0x2c9   :  { %1130 = vmatpush.msrb.mxu3 %v802_v55  ;;  %1066 = vmatpush.msrb.mxu2 %v670_v56  ;;  %v751_v56 = vadd.f32 %v2285_v26, %v2269_v4  ;;  %v736_v26 = vadd.f32 %v2236_v0, %v2269_v4 }
 0x2cb   :  { %1131 = vmatpush.msrb.mxu3 %v799_v10  ;;  %1067 = vmatpush.msrb.mxu2 %v667_v3  ;;  %v769_v10 = vadd.f32 %v768_v15, %v2269_v4 }
 0x2cd   :  { %1132 = vmatpush.msrb.mxu3 %v796_v14  ;;  %1068 = vmatpush.msrb.mxu2 %v664_v57  ;;  %v757_v14 = vadd.f32 %v2319_v27, %v2269_v4  ;;  %v742_v27 = vadd.f32 %v2250_v22, %v2269_v4 }
 0x2cf   :  { %1133 = vmatpush.msrb.mxu3 %v793_v61  ;;  %1069 = vmatpush.msrb.mxu2 %v661_v29 }
 0x2d0   :  { %v771_v1 = vpop.f32.mrf.mxu1 }
 0x2d1   :  { %1134 = vmatpush.msrb.mxu3 %v790_v46  ;;  %1070 = vmatpush.msrb.mxu2 %v658_v13  ;;  %v772_v16 = vadd.f32 %v771_v1, %v2269_v4  ;;  %v1146_v1 = vld [vmem:[%s2497_s7 + $0x20] sm:$0xff] }
 0x2d3   :  { %1135 = vmatpush.msrb.mxu3 %v787_v33  ;;  %1071 = vmatpush.msrb.mxu2 %v655_v48 }
 0x2d5   :  { %1136 = vmatpush.msrb.mxu3 %v784_v59  ;;  %1072 = vmatpush.msrb.mxu2 %v652_v41 }
 0x2d7   :  { %1137 = vmatpush.msrb.mxu3 %v781_v2  ;;  %1073 = vmatpush.msrb.mxu2 %v649_v36 }
 0x2d9   :  { %1074 = vmatpush.msrb.mxu2 %v646_v54 }
 0x2db   :  { %1075 = vmatpush.msrb.mxu2 %v643_v49  ;;  %v959_v9 = vpop.f32.mrf.mxu3  ;;  %v1156_v49 = vld [vmem:[%s2497_s7 + $0x70] sm:$0xff] }
 0x2dc   :  { %v1003_v45 = vmul.f32 0.17677669, %v959_v9 }
 0x2dd   :  { %1076 = vmatpush.msrb.mxu2 %v640_v17  ;;  %v1153_v17 = vld [vmem:[%s2497_s7 + $0x58] sm:$0xff] }
 0x2de   :  { %v1006_v55 = vmax.f32 %v1002_v42, %v1003_v45 }
 0x2df   :  { %1077 = vmatpush.msrb.mxu2 %v637_v37  ;;  %v1150_v37 = vld [vmem:[%s2497_s7 + $0x40] sm:$0xff] }
 0x2e0   :  { %1007 = vmax.xlane.f32.xlu1 %v1006_v55  ;;  %v1145_v55 = vld [vmem:[%s2497_s7 + $0x18] sm:$0xff] }
 0x2e1   :  { %1102 = vmatpush.msra.mxu2 %v778_v31  ;;  %v1148_v31 = vld [vmem:[%s2497_s7 + $0x30] sm:$0xff] }
 0x2e3   :  { %1103 = vmatpush.msra.mxu2 %v775_v25 }
 0x2e5   :  { %1104 = vmatpush.msra.mxu2 %v772_v16 }
 0x2e7   :  { %1105 = vmatpush.msra.mxu2 %v769_v10  ;;  %v1144_v10 = vld [vmem:[%s2497_s7 + $0x10] sm:$0xff] }
 0x2e9   :  { %1106 = vmatpush.msra.mxu2 %v766_v34 }
 0x2eb   :  { %1107 = vmatpush.msra.mxu2 %v763_v20 }
 0x2ed   :  { %1108 = vmatpush.msra.mxu2 %v760_v38 }
 0x2ef   :  { %1109 = vmatpush.msra.mxu2 %v757_v14 }
 0x2f1   :  { %1110 = vmatpush.msra.mxu2 %v754_v7  ;;  %v1143_v7 = vld [vmem:[%s2497_s7 + $0x8] sm:$0xff] }
 0x2f3   :  { %1111 = vmatpush.msra.mxu2 %v751_v56 }
 0x2f5   :  { %1112 = vmatpush.msra.mxu2 %v748_v35 }
 0x2f7   :  { %1113 = vmatpush.msra.mxu2 %v745_v60  ;;  %v1142_v60 = vld [vmem:[%s2497_s7] sm:$0xff] }
 0x2f9   :  { %1114 = vmatpush.msra.mxu2 %v742_v27 }
 0x2fb   :  { %1115 = vmatpush.msra.mxu2 %v739_v30 }
 0x2fd   :  { %1116 = vmatpush.msra.mxu2 %v736_v26 }
 0x2ff   :  { %1117 = vmatpush.msra.mxu2 %v733_v52 }
 0x31b   :  { %v999_v11 = vpop.f32.mrf.mxu3 }
 0x31c   :  { %v1005_v61 = vmul.f32 0.17677669, %v999_v11 }
 0x343   :  { %v979_v5 = vpop.f32.mrf.mxu2 }
 0x344   :  { %v1004_v62 = vmul.f32 0.17677669, %v979_v5 }
 0x346   :  { %v1009_v3 = vmax.f32 %v1004_v62, %v1005_v61 }
 0x348   :  { %1010 = vmax.xlane.f32.xlu1 %v1009_v3 }
 0x353   :  { %v1008_v22 = vpop.xlane.xlu1 %1007 }
 0x354   :  { %v1012_v51 = vsub.f32 %v1002_v42, %v1008_v22  ;;  %v1013_v46 = vsub.f32 %v1003_v45, %v1008_v22  ;;  %v1152_v42 = vld [vmem:[%s2497_s7 + $0x50] sm:$0xff]  ;;  %v1147_v45 = vld [vmem:[%s2497_s7 + $0x28] sm:$0xff]  ;;  %s1187_s7 = sshll.u32 %s1384_s17, 4  ;;  %s1188_s7 = int_to_ptr.vmem [resolvable:$true] %s1187_s7 }
 0x356   :  { %v1016_v23 = vmul.f32 1.442695, %v1012_v51  ;;  %v1018_v40 = vmul.f32 1.442695, %v1013_v46 }
 0x358   :  { %1344 = vpow2.f32 %v1016_v23 }
 0x359   :  { %1346 = vpow2.f32 %v1018_v40 }
 0x35e   :  { %v1345_v0 = vpop.eup %1344 }
 0x35f   :  { %v1347_v57 = vpop.eup %1346 }
 0x360   :  { %v1024_v63 = vadd.f32 %v1347_v57, %v1345_v0 }
 0x362   :  { %1025 = vadd.xlane.f32.xlu2 %v1024_v63 }
 0x3bb   :  { %v1011_v12 = vpop.xlane.xlu1 %1010 }
 0x3bc   :  { %v1014_v4 = vsub.f32 %v1004_v62, %v1011_v12  ;;  %v1015_v28 = vsub.f32 %v1005_v61, %v1011_v12 }
 0x3be   :  { %v1020_v33 = vmul.f32 1.442695, %v1014_v4  ;;  %v1022_v50 = vmul.f32 1.442695, %v1015_v28 }
 0x3c0   :  { %1348 = vpow2.f32 %v1020_v33 }
 0x3c1   :  { %1350 = vpow2.f32 %v1022_v50 }
 0x3c6   :  { %v2431_v29 = vpop.eup %1348 }
 0x3c7   :  { %v2433_v44 = vpop.eup %1350 }
 0x3c8   :  { %v1027_v59 = vadd.f32 %v2433_v44, %v2431_v29 }
 0x3ca   :  { %1028 = vadd.xlane.f32.xlu2 %v1027_v59 }
 0x3d5   :  { %v1026_v43 = vpop.xlane.xlu2 %1025 }
 0x3d6   :  { %1352 = vrcp.f32 %v1026_v43  ;;  %v1041_v47 = vand.u32 2147483648, %v1026_v43  ;;  %v1039_v39 = vand.u32 2147483647, %v1026_v43  ;;  %vm1035_vm5 = vweird.f32 %v1026_v43 }
 0x3d8   :  { %v1042_v32 = vor.u32 1.1754944e-38, %v1041_v47  ;;  %vm1040_vm7 = vcmp.eq.f32.partialorder %v1039_v39, 8.507059e+37 }
 0x3dc   :  { %v1353_v13 = vpop.eup %1352 }
 0x3dd   :  { %v1031_v18 = vmul.f32 %v1353_v13, %v1026_v43  ;;  %vm1036_vm4 = vweird.f32 %v1353_v13 }
 0x3de   :  { %vm1037_vm6 = vmor %vm1035_vm5, %vm1036_vm4 }
 0x3df   :  { %v1032_v2 = vsub.f32 1.0, %v1031_v18 }
 0x3e1   :  { %v1033_v48 = vmul.f32 %v1353_v13, %v1032_v2 }
 0x3e3   :  { %v1034_v41 = vadd.f32 %v1353_v13, %v1033_v48 }
 0x3e5   :  { %v1038_v36 = vsel %vm1037_vm6, %v1353_v13, %v1034_v41 }
 0x3e6   :  { %v1043_v15 = vsel %vm1040_vm7, %v1042_v32, %v1038_v36 }
 0x3e7   :  { %v1058_v19 = vmul.f32 %v1345_v0, %v1043_v15  ;;  %v1059_v54 = vmul.f32 %v1347_v57, %v1043_v15 }
 0x3e9   :  { %1078 = vmatmul.f32.vlgmr.msrb.gmra.mxu2 %v1058_v19  ;;  %1098 = vmatmul.f32.vlgmr.msra.gmra.mxu3 %v1059_v54 }
 0x3ea   :  { %1158 = vmatpush.msrb.mxu2 %v1157_v53 }
 0x3ec   :  { %1159 = vmatpush.msrb.mxu2 %v1156_v49 }
 0x3ee   :  { %1160 = vmatpush.msrb.mxu2 %v1155_v8 }
 0x3f0   :  { %1161 = vmatpush.msrb.mxu2 %v1154_v21 }
 0x3f2   :  { %1162 = vmatpush.msrb.mxu2 %v1153_v17 }
 0x3f4   :  { %1163 = vmatpush.msrb.mxu2 %v1152_v42 }
 0x3f6   :  { %1164 = vmatpush.msrb.mxu2 %v1151_v58 }
 0x3f8   :  { %1165 = vmatpush.msrb.mxu2 %v1150_v37 }
 0x3fa   :  { %1166 = vmatpush.msrb.mxu2 %v1149_v6 }
 0x3fc   :  { %1167 = vmatpush.msrb.mxu2 %v1148_v31 }
 0x3fe   :  { %1168 = vmatpush.msrb.mxu2 %v1147_v45 }
 0x400   :  { %1169 = vmatpush.msrb.mxu2 %v1146_v1 }
 0x402   :  { %1170 = vmatpush.msrb.mxu2 %v1145_v55 }
 0x404   :  { %1171 = vmatpush.msrb.mxu2 %v1144_v10 }
 0x406   :  { %1172 = vmatpush.msrb.mxu2 %v1143_v7 }
 0x408   :  { %1173 = vmatpush.msrb.mxu2 %v1142_v60 }
 0x43d   :  { %v1029_v9 = vpop.xlane.xlu2 %1028 }
 0x43e   :  { %1354 = vrcp.f32 %v1029_v9  ;;  %v1055_v34 = vand.u32 2147483648, %v1029_v9  ;;  %v1053_v38 = vand.u32 2147483647, %v1029_v9  ;;  %vm1049_vm9 = vweird.f32 %v1029_v9 }
 0x440   :  { %v1056_v56 = vor.u32 1.1754944e-38, %v1055_v34  ;;  %vm1054_vm11 = vcmp.eq.f32.partialorder %v1053_v38, 8.507059e+37 }
 0x444   :  { %v1355_v24 = vpop.eup %1354 }
 0x445   :  { %v1045_v25 = vmul.f32 %v1355_v24, %v1029_v9  ;;  %vm1050_vm8 = vweird.f32 %v1355_v24 }
 0x446   :  { %vm1051_vm10 = vmor %vm1049_vm9, %vm1050_vm8 }
 0x447   :  { %v1046_v16 = vsub.f32 1.0, %v1045_v25 }
 0x449   :  { %v1047_v20 = vmul.f32 %v1355_v24, %v1046_v16 }
 0x44b   :  { %v1048_v14 = vadd.f32 %v1355_v24, %v1047_v20 }
 0x44d   :  { %v1052_v35 = vsel %vm1051_vm10, %v1355_v24, %v1048_v14 }
 0x44e   :  { %v1057_v27 = vsel %vm1054_vm11, %v1056_v56, %v1052_v35 }
 0x44f   :  { %v1060_v30 = vmul.f32 %v2431_v29, %v1057_v27  ;;  %v1061_v26 = vmul.f32 %v2433_v44, %v1057_v27 }
 0x451   :  { %1118 = vmatmul.f32.vlgmr.msra.gmra.mxu2 %v1060_v30  ;;  %1138 = vmatmul.f32.vlgmr.msrb.gmra.mxu3 %v1061_v26 }
 0x46c   :  { %v1079_v52 = vpop.f32.mrf.mxu2  ;;  %v1099_v11 = vpop.f32.mrf.mxu3 }
 0x46d   :  { %v1100_v5 = vadd.f32 %v1099_v11, %v1079_v52 }
 0x46f   :  { %1174 = vmatmul.f32.vlgmr.msrb.gmra.mxu2 %v1100_v5 }
 0x4d4   :  { %v1119_v61 = vpop.f32.mrf.mxu2  ;;  %v1139_v62 = vpop.f32.mrf.mxu3 }
 0x4d5   :  { %v1140_v3 = vadd.f32 %v1139_v62, %v1119_v61 }
 0x4d7   :  { %1177 = vmatmul.f32.gmra.mxu2 %v1140_v3 }
 0x4f2   :  { %v1175_v22 = vpop.f32.mrf.mxu2 }
 0x4f3   :  { %1181 = vst [vmem:[#allocation2] sm:$0xff] %v1175_v22 }
 0x55a   :  { %v1178_v51 = vpop.f32.mrf.mxu2 }
 0x55b   :  { %1182 = vst [vmem:[#allocation2 + $0x8] sm:$0xff] %v1178_v51 }
 0x55c   :  { %1195 = dma.vmem_to_hbm [thread:$0]  %s1188_s7, 256, %s1190_s20, [#allocation3], %s1385_s21, %s1385_s21, %s1386_s22  }
 0x55d   :  { %1380 = dma.done.wait [#allocation3], 256  }
 0x55e   :  { %1381 = vsyncadd [#allocation3], 4294967040 }
 0x55f   :  { %1200 = vsyncpa [#allocation3], 1 }

</bundles_post_ra>
